<compile_context>
chip_gen: v5e
topology: v5e:2x2
jax: 0.10.0
libtpu: 0.0.40
codegen_flags: <defaults>
</compile_context>

<pallas_src>
import functools

import jax
import jax.numpy as jnp
from jax import lax
from jax.experimental import pallas as pl
from jax.experimental.pallas import tpu as pltpu

EPS = 1e-5  # nn.LayerNorm default


def _layernorm(x, g, b):
    x = x.astype(jnp.float32)
    mu = jnp.mean(x, axis=-1, keepdims=True)
    var = jnp.mean((x - mu) ** 2, axis=-1, keepdims=True)
    return (x - mu) * lax.rsqrt(var + EPS) * g + b


def _gelu(x):
    # TODO(synk): PyTorch nn.GELU() is the exact erf variant; the tanh
    # approximation is used since erf lowering in Mosaic is not guaranteed.
    c = 0.7978845608028654  # sqrt(2/pi)
    return 0.5 * x * (1.0 + jnp.tanh(c * (x + 0.044715 * x * x * x)))


# ------------------------------ fused kernel ------------------------------- #

def vit_fused_kernel(xp_ref, pw_ref, pb_ref,
                     ln1g_ref, ln1b_ref, wqkv_ref, wo_ref, bo_ref,
                     ln2g_ref, ln2b_ref, w1_ref, b1_ref, w2_ref, b2_ref,
                     ng_ref, nb_ref, ow_ref, ob_ref,
                     y_ref, tok_ref, *, batch, seq, nhead):
    # grid = (batch_split, layer); axis 0 is "parallel" (megacore), axis 1
    # carries state ("arbitrary").
    l = pl.program_id(1)

    # --- layer-0 prologue: patch embedding (strided conv as one matmul) ----
    @pl.when(l == 0)
    def _():
        tok_ref[...] = (
            jnp.dot(xp_ref[...], pw_ref[...],
                    preferred_element_type=jnp.float32) + pb_ref[...])

    x = tok_ref[...]                               # (Bc*N, E) f32 residual stream
    bn, emb = x.shape
    dh = emb // nhead
    scale = dh ** -0.5

    # --- PreNorm + multi-head self-attention --------------------------------
    # Single fused lane-dense QKV matmul: (Bc*N, E) x (E, 3E).
    h = _layernorm(x, ln1g_ref[0], ln1b_ref[0]).astype(jnp.bfloat16)
    qkv = jnp.dot(h, wqkv_ref[0], preferred_element_type=jnp.float32)
    q = (qkv[:, :emb] * scale).astype(jnp.bfloat16)       # scale on f32 scores/Q
    k = qkv[:, emb:2 * emb].astype(jnp.bfloat16)
    v = qkv[:, 2 * emb:].astype(jnp.bfloat16)

    # Head/batch split is pure layout plumbing (static slices + stack); the
    # matmuls below are single batched MXU contractions over x = Bc*H.
    def split_heads(t):   # (Bc*N, E) -> (Bc*H, N, dh)
        return jnp.stack(
            [t[b * seq:(b + 1) * seq, hd * dh:(hd + 1) * dh]
             for b in range(batch) for hd in range(nhead)], axis=0)

    qh, kh, vh = split_heads(q), split_heads(k), split_heads(v)

    s = jnp.einsum('xnd,xmd->xnm', qh, kh,
                   preferred_element_type=jnp.float32)      # (Bc*H, N, N)
    s = s - jnp.max(s, axis=-1, keepdims=True)
    p = jnp.exp(s)
    p = p * pl.reciprocal(jnp.sum(p, axis=-1, keepdims=True), approx=True)
    o = jnp.einsum('xnm,xmd->xnd', p.astype(jnp.bfloat16), vh,
                   preferred_element_type=jnp.float32)      # (Bc*H, N, dh)

    # Back to token-major (Bc*N, H*dh = E); the cross-head reduction then
    # happens for free in the MXU K dimension of a single (E, E) matmul.
    o_tok = jnp.concatenate(
        [jnp.concatenate([o[b * nhead + hd] for hd in range(nhead)], axis=-1)
         for b in range(batch)], axis=0).astype(jnp.bfloat16)
    x = x + jnp.dot(o_tok, wo_ref[0],
                    preferred_element_type=jnp.float32) + bo_ref[0]

    # --- PreNorm + FeedForward (E -> 2E -> E) --------------------------------
    h2 = _layernorm(x, ln2g_ref[0], ln2b_ref[0]).astype(jnp.bfloat16)
    t = jnp.dot(h2, w1_ref[0], preferred_element_type=jnp.float32) + b1_ref[0]
    t = _gelu(t).astype(jnp.bfloat16)
    t = jnp.dot(t, w2_ref[0], preferred_element_type=jnp.float32) + b2_ref[0]
    x = x + t
    tok_ref[...] = x

    # --- last-layer epilogue: final LayerNorm + 1x1 conv (lane-padded head) --
    @pl.when(l == pl.num_programs(1) - 1)
    def _():
        hf = _layernorm(x, ng_ref[...], nb_ref[...]).astype(jnp.bfloat16)
        y_ref[...] = (jnp.dot(hf, ow_ref[...],
                              preferred_element_type=jnp.float32) + ob_ref[...])


# ------------------------------ param packing ------------------------------ #

def pack_params(params):
    """Repack PyTorch-layout params into the fused-kernel layout.

    Per-layer weights are stacked along a leading L axis (one pallas_call,
    pipelined weight DMA); to_qkv stays fused as a single (E, 3E) lane-dense
    matrix; matrices are cast to bf16 (f32 accumulation stays in the kernel
    via preferred_element_type); head weights are zero-padded to a lane-dense
    (multiple of 128) output width.  In production this packing would be done
    once, outside the forward.
    """
    bf16, f32 = jnp.bfloat16, jnp.float32

    def stack(name):
        return jnp.stack([lay[name] for lay in params["layers"]], axis=0)

    wqkv = stack("wqkv")                                  # (L, E, 3*inner)
    L = wqkv.shape[0]
    out_w, out_b = params["out_w"], params["out_b"]
    out_c = out_w.shape[1]
    ocp = max(128, ((out_c + 127) // 128) * 128)          # lane-dense head width

    return {
        "num_layers": L,
        "out_c": out_c,
        "patch_w": params["patch_w"].astype(bf16),        # (Cpp, E)
        "patch_b": params["patch_b"].astype(f32),         # (1, E)
        "ln1_g": stack("ln1_g").astype(f32),              # (L, 1, E)
        "ln1_b": stack("ln1_b").astype(f32),
        "wqkv": wqkv.astype(bf16),                        # (L, E, 3E) fused QKV
        "wo": stack("wo").astype(bf16),                   # (L, E, E)
        "bo": stack("bo").astype(f32),                    # (L, 1, E)
        "ln2_g": stack("ln2_g").astype(f32),
        "ln2_b": stack("ln2_b").astype(f32),
        "w1": stack("w1").astype(bf16),                   # (L, E, 2E)
        "b1": stack("b1").astype(f32),                    # (L, 1, 2E)
        "w2": stack("w2").astype(bf16),                   # (L, 2E, E)
        "b2": stack("b2").astype(f32),                    # (L, 1, E)
        "norm_g": params["norm_g"].astype(f32),           # (1, E)
        "norm_b": params["norm_b"].astype(f32),
        "out_w": jnp.pad(out_w, ((0, 0), (0, ocp - out_c))).astype(bf16),
        "out_b": jnp.pad(out_b, ((0, 0), (0, ocp - out_c))).astype(f32),
    }


# -------------------------------- wrapper ----------------------------------- #

def vit_forward(x, params, *, patch_size, embed_dim, nhead, scale_factor):
    B, C, H, W = x.shape
    p = patch_size
    Hp, Wp = H // p, W // p
    N = Hp * Wp
    E = embed_dim
    assert E % nhead == 0, "embed_dim must be divisible by nhead"
    Cpp = C * p * p
    BN = B * N

    # Patchify NCHW -> (B*N, C*p*p); per-patch feature order is (C, ph, pw),
    # matching Conv2d(kernel=stride=patch) weight layout (E, C, p, p).  Cast
    # to bf16 here (it is resident in VMEM for the whole layer loop).
    xp = (x.reshape(B, C, Hp, p, Wp, p)
           .transpose(0, 2, 4, 1, 3, 5)
           .reshape(BN, Cpp)).astype(jnp.bfloat16)

    P = pack_params(params)
    L = P["num_layers"]
    out_c = P["out_c"]
    ocp = P["out_w"].shape[1]

    # Batch split across TensorCores (2 TCs on v7x); no-op on single-TC chips.
    NB = 2 if (B % 2 == 0 and ((B // 2) * N) % 8 == 0) else 1
    Bc = B // NB
    rows = Bc * N

    def const_spec(a):         # constant block across the whole grid
        nd = a.ndim
        return pl.BlockSpec(tuple(a.shape), lambda b, l, _nd=nd: (0,) * _nd)

    def layer_spec(a):         # per-layer block -> pipelined weight prefetch
        nd = a.ndim
        return pl.BlockSpec((1,) + tuple(a.shape[1:]),
                            lambda b, l, _nd=nd: (l,) + (0,) * (_nd - 1))

    xp_spec = pl.BlockSpec((rows, Cpp), lambda b, l: (b, 0))

    const_pre = (P["patch_w"], P["patch_b"])
    layer_args = (P["ln1_g"], P["ln1_b"], P["wqkv"], P["wo"], P["bo"],
                  P["ln2_g"], P["ln2_b"], P["w1"], P["b1"], P["w2"], P["b2"])
    const_head = (P["norm_g"], P["norm_b"], P["out_w"], P["out_b"])

    in_specs = ([xp_spec] + [const_spec(a) for a in const_pre]
                + [layer_spec(a) for a in layer_args]
                + [const_spec(a) for a in const_head])

    y = pl.pallas_call(
        functools.partial(vit_fused_kernel, batch=Bc, seq=N, nhead=nhead),
        out_shape=jax.ShapeDtypeStruct((BN, ocp), jnp.float32),
        grid=(NB, L),
        in_specs=in_specs,
        # Constant block index over l -> output stays resident across layers.
        out_specs=pl.BlockSpec((rows, ocp), lambda b, l: (b, 0)),
        scratch_shapes=[pltpu.VMEM((rows, E), jnp.float32)],   # resident tokens
        compiler_params=pltpu.CompilerParams(
            # Batch-split axis is embarrassingly parallel (megacore on v7x);
            # the layer axis carries state -> sequential ("arbitrary").
            dimension_semantics=("parallel", "arbitrary"),
            # Below v7x's 64 MiB physical VMEM, leaving headroom for internal
            # scratch and the double-buffered per-layer weight DMA.
            vmem_limit_bytes=48 * 1024 * 1024),
    )(xp, *const_pre, *layer_args, *const_head)

    # Drop lane padding, back to NCHW, nearest-neighbor upsample via
    # broadcast+reshape (pure data movement, no repeated materialized copies).
    y = y[:, :out_c].reshape(B, Hp, Wp, out_c).transpose(0, 3, 1, 2)
    s = int(scale_factor)
    y = jnp.broadcast_to(y[:, :, :, None, :, None], (B, out_c, Hp, s, Wp, s))
    return y.reshape(B, out_c, Hp * s, Wp * s)


# --------------------------- pure-JAX reference ----------------------------- #

def vit_reference(x, params, *, patch_size, embed_dim, nhead, scale_factor):
    """f32 reference mirroring the PyTorch module (exact-erf GELU, softmax)."""
    B, C, H, W = x.shape
    p = patch_size
    Hp, Wp = H // p, W // p
    N = Hp * Wp
    E = embed_dim
    dh = E // nhead

    def ln(z, g, b):
        mu = z.mean(-1, keepdims=True)
        var = ((z - mu) ** 2).mean(-1, keepdims=True)
        return (z - mu) / jnp.sqrt(var + EPS) * g + b

    xp = (x.reshape(B, C, Hp, p, Wp, p)
           .transpose(0, 2, 4, 1, 3, 5)
           .reshape(B, N, C * p * p))
    t = xp @ params["patch_w"] + params["patch_b"]                 # (B, N, E)

    for lay in params["layers"]:
        h = ln(t, lay["ln1_g"], lay["ln1_b"])
        qkv = h @ lay["wqkv"]                                      # (B, N, 3*inner)
        inner = qkv.shape[-1] // 3
        q, k, v = (qkv[..., :inner], qkv[..., inner:2 * inner],
                   qkv[..., 2 * inner:])

        def split(z):
            return z.reshape(B, N, nhead, dh).transpose(0, 2, 1, 3)
        q, k, v = split(q), split(k), split(v)
        s = jnp.einsum('bhnd,bhmd->bhnm', q, k) * (dh ** -0.5)
        a = jax.nn.softmax(s, axis=-1)
        o = jnp.einsum('bhnm,bhmd->bhnd', a, v)
        o = o.transpose(0, 2, 1, 3).reshape(B, N, inner)
        t = t + (o @ lay["wo"] + lay["bo"])

        h = ln(t, lay["ln2_g"], lay["ln2_b"])
        h = jax.nn.gelu(h @ lay["w1"] + lay["b1"], approximate=False)
        t = t + (h @ lay["w2"] + lay["b2"])

    t = ln(t, params["norm_g"], params["norm_b"])
    y = t @ params["out_w"] + params["out_b"]                      # (B, N, out_c)
    out_c = y.shape[-1]
    y = y.reshape(B, Hp, Wp, out_c).transpose(0, 3, 1, 2)
    s = int(scale_factor)
    return jnp.repeat(jnp.repeat(y, s, axis=2), s, axis=3)


# -------------------------------- params ------------------------------------ #

def init_params(key, *, in_channels, patch_size, embed_dim, nhead, num_layers,
                output_channels):
    """PyTorch-layout parameters (input-dim-first Linear weights)."""
    E = embed_dim
    Cpp = in_channels * patch_size * patch_size
    mlp = 2 * E
    inner = (E // nhead) * nhead          # dim_head * nhead == embed_dim
    ks = jax.random.split(key, 2 + num_layers)

    def dense(k, shape, sc=0.02):
        return (sc * jax.random.normal(k, shape)).astype(jnp.float32)

    params = {
        "patch_w": dense(ks[0], (Cpp, E)),
        "patch_b": 0.01 * jnp.ones((1, E), jnp.float32),
        "norm_g": jnp.ones((1, E), jnp.float32),
        "norm_b": jnp.zeros((1, E), jnp.float32),
        "out_w": dense(ks[1], (E, output_channels)),
        "out_b": 0.01 * jnp.ones((1, output_channels), jnp.float32),
        "layers": [],
    }
    for i in range(num_layers):
        lk = jax.random.split(ks[2 + i], 4)
        params["layers"].append({
            "ln1_g": jnp.ones((1, E), jnp.float32),
            "ln1_b": jnp.zeros((1, E), jnp.float32),
            "wqkv": dense(lk[0], (E, 3 * inner)),      # to_qkv (no bias)
            "wo":   dense(lk[1], (inner, E)),          # to_out Linear
            "bo":   jnp.zeros((1, E), jnp.float32),
            "ln2_g": jnp.ones((1, E), jnp.float32),
            "ln2_b": jnp.zeros((1, E), jnp.float32),
            "w1":   dense(lk[2], (E, mlp)),
            "b1":   jnp.zeros((1, mlp), jnp.float32),
            "w2":   dense(lk[3], (mlp, E)),
            "b2":   jnp.zeros((1, E), jnp.float32),
        })
    return params


if __name__ == "__main__":
    # Small shapes consistent with the module's forward.
    B, C, H, W = 2, 4, 16, 16
    patch_size, embed_dim, nhead, num_layers = 4, 64, 4, 2
    output_channels, scale_factor = 8, 2

    key = jax.random.PRNGKey(0)
    kx, kp = jax.random.split(key)
    x = jax.random.normal(kx, (B, C, H, W), dtype=jnp.float32)
    params = init_params(kp, in_channels=C, patch_size=patch_size,
                         embed_dim=embed_dim, nhead=nhead,
                         num_layers=num_layers, output_channels=output_channels)

    fwd = jax.jit(functools.partial(vit_forward, patch_size=patch_size,
                                    embed_dim=embed_dim, nhead=nhead,
                                    scale_factor=scale_factor))
    y = jax.block_until_ready(fwd(x, params))

    expected = (B, output_channels,
                (H // patch_size) * scale_factor, (W // patch_size) * scale_factor)
    assert y.shape == expected, (y.shape, expected)
    assert bool(jnp.all(jnp.isfinite(y)))

    # Numerical sanity check vs a pure-JAX f32 reference (tolerance accounts
    # for bf16 matmul inputs, tanh-GELU, and the approximate softmax divide).
    y_ref = vit_reference(x, params, patch_size=patch_size,
                          embed_dim=embed_dim, nhead=nhead,
                          scale_factor=scale_factor)
    err = float(jnp.max(jnp.abs(y - y_ref)))
    assert err < 5e-2, f"max abs error vs reference: {err}"
    print("KERNEL_OK")
</pallas_src>

<mosaic_0001>
module attributes {stable_mosaic.version = 11 : i64} {
  func.func @vit_fused_kernel(%arg0: i32, %arg1: i32, %arg2: memref<16x64xbf16, #tpu.memory_space<vmem>>, %arg3: memref<64x64xbf16, #tpu.memory_space<vmem>>, %arg4: memref<1x64xf32, #tpu.memory_space<vmem>>, %arg5: memref<1x1x64xf32, #tpu.memory_space<vmem>>, %arg6: memref<1x1x64xf32, #tpu.memory_space<vmem>>, %arg7: memref<1x64x192xbf16, #tpu.memory_space<vmem>>, %arg8: memref<1x64x64xbf16, #tpu.memory_space<vmem>>, %arg9: memref<1x1x64xf32, #tpu.memory_space<vmem>>, %arg10: memref<1x1x64xf32, #tpu.memory_space<vmem>>, %arg11: memref<1x1x64xf32, #tpu.memory_space<vmem>>, %arg12: memref<1x64x128xbf16, #tpu.memory_space<vmem>>, %arg13: memref<1x1x128xf32, #tpu.memory_space<vmem>>, %arg14: memref<1x128x64xbf16, #tpu.memory_space<vmem>>, %arg15: memref<1x1x64xf32, #tpu.memory_space<vmem>>, %arg16: memref<1x64xf32, #tpu.memory_space<vmem>>, %arg17: memref<1x64xf32, #tpu.memory_space<vmem>>, %arg18: memref<64x128xbf16, #tpu.memory_space<vmem>>, %arg19: memref<1x128xf32, #tpu.memory_space<vmem>>, %arg20: memref<16x128xf32, #tpu.memory_space<vmem>>, %arg21: memref<16x64xf32, #tpu.memory_space<vmem>>) attributes {dimension_semantics = [#tpu.dimension_semantics<parallel>, #tpu.dimension_semantics<arbitrary>], iteration_bounds = array<i64: 2, 2>, scalar_prefetch = 0 : i64, scratch_operands = 1 : i64, tpu.core_type = #tpu.core_type<tc>, window_params = [{transform_indices = @transform_0, window_bounds = array<i64: 16, 64>}, {pipeline_mode = #tpu.pipeline_mode<synchronous>, transform_indices = @transform_1, window_bounds = array<i64: 64, 64>}, {pipeline_mode = #tpu.pipeline_mode<synchronous>, transform_indices = @transform_2, window_bounds = array<i64: 1, 64>}, {transform_indices = @transform_3, window_bounds = array<i64: 1, 1, 64>}, {transform_indices = @transform_4, window_bounds = array<i64: 1, 1, 64>}, {transform_indices = @transform_5, window_bounds = array<i64: 1, 64, 192>}, {transform_indices = @transform_6, window_bounds = array<i64: 1, 64, 64>}, {transform_indices = @transform_7, window_bounds = array<i64: 1, 1, 64>}, {transform_indices = @transform_8, window_bounds = array<i64: 1, 1, 64>}, {transform_indices = @transform_9, window_bounds = array<i64: 1, 1, 64>}, {transform_indices = @transform_10, window_bounds = array<i64: 1, 64, 128>}, {transform_indices = @transform_11, window_bounds = array<i64: 1, 1, 128>}, {transform_indices = @transform_12, window_bounds = array<i64: 1, 128, 64>}, {transform_indices = @transform_13, window_bounds = array<i64: 1, 1, 64>}, {pipeline_mode = #tpu.pipeline_mode<synchronous>, transform_indices = @transform_14, window_bounds = array<i64: 1, 64>}, {pipeline_mode = #tpu.pipeline_mode<synchronous>, transform_indices = @transform_15, window_bounds = array<i64: 1, 64>}, {pipeline_mode = #tpu.pipeline_mode<synchronous>, transform_indices = @transform_16, window_bounds = array<i64: 64, 128>}, {pipeline_mode = #tpu.pipeline_mode<synchronous>, transform_indices = @transform_17, window_bounds = array<i64: 1, 128>}, {transform_indices = @transform_18, window_bounds = array<i64: 16, 128>}]} {
    %c0_i32 = arith.constant 0 : i32
    %0 = arith.cmpi eq, %arg1, %c0_i32 : i32
    %1 = arith.extui %0 : i1 to i32
    %c0_i32_0 = arith.constant 0 : i32
    %2 = arith.cmpi ne, %1, %c0_i32_0 : i32
    scf.if %2 {
      %c0_60 = arith.constant 0 : index
      %c0_61 = arith.constant 0 : index
      %160 = vector.load %arg2[%c0_60, %c0_61] : memref<16x64xbf16, #tpu.memory_space<vmem>>, vector<16x64xbf16>
      %c0_62 = arith.constant 0 : index
      %c0_63 = arith.constant 0 : index
      %161 = vector.load %arg3[%c0_62, %c0_63] : memref<64x64xbf16, #tpu.memory_space<vmem>>, vector<64x64xbf16>
      %cst_64 = arith.constant dense<0.000000e+00> : vector<16x64xf32>
      %162 = tpu.matmul %160, %161, %cst_64 {dimension_numbers = #tpu.dot_dimension_numbers<[1], [0], [0], [1], [0, 0, 1, 1], [], []>} : vector<16x64xbf16>, vector<64x64xbf16>, vector<16x64xf32> -> vector<16x64xf32>
      %c0_65 = arith.constant 0 : index
      %c0_66 = arith.constant 0 : index
      %163 = vector.load %arg4[%c0_65, %c0_66] : memref<1x64xf32, #tpu.memory_space<vmem>>, vector<1x64xf32>
      %164 = vector.broadcast %163 : vector<1x64xf32> to vector<16x64xf32>
      %165 = arith.addf %162, %164 : vector<16x64xf32>
      %c0_67 = arith.constant 0 : index
      %c0_68 = arith.constant 0 : index
      %166 = vector.load %arg21[%c0_67, %c0_68] : memref<16x64xf32, #tpu.memory_space<vmem>>, vector<16x64xf32>
      tpu.vector_store %arg21[%c0_67, %c0_68], %165 {strides = array<i32>} : memref<16x64xf32, #tpu.memory_space<vmem>>, vector<16x64xf32>,
    } else {
    }
    %c0 = arith.constant 0 : index
    %c0_1 = arith.constant 0 : index
    %3 = vector.load %arg21[%c0, %c0_1] : memref<16x64xf32, #tpu.memory_space<vmem>>, vector<16x64xf32>
    %c0_2 = arith.constant 0 : index
    %c0_3 = arith.constant 0 : index
    %c0_4 = arith.constant 0 : index
    %4 = vector.load %arg5[%c0_2, %c0_3, %c0_4] : memref<1x1x64xf32, #tpu.memory_space<vmem>>, vector<1x1x64xf32>
    %5 = vector.shape_cast %4 : vector<1x1x64xf32> to vector<1x64xf32>
    %c0_5 = arith.constant 0 : index
    %c0_6 = arith.constant 0 : index
    %c0_7 = arith.constant 0 : index
    %6 = vector.load %arg6[%c0_5, %c0_6, %c0_7] : memref<1x1x64xf32, #tpu.memory_space<vmem>>, vector<1x1x64xf32>
    %7 = vector.shape_cast %6 : vector<1x1x64xf32> to vector<1x64xf32>
    %cst = arith.constant dense<0.000000e+00> : vector<16xf32>
    %8 = vector.multi_reduction <add>, %3, %cst [1] : vector<16x64xf32> to vector<16xf32>
    %9 = vector.shape_cast %8 : vector<16xf32> to vector<16x1xf32>
    %cst_8 = arith.constant 6.400000e+01 : f32
    %10 = vector.broadcast %cst_8 : f32 to vector<16x1xf32>
    %11 = arith.divf %9, %10 : vector<16x1xf32>
    %12 = vector.broadcast %11 : vector<16x1xf32> to vector<16x64xf32>
    %13 = arith.subf %3, %12 : vector<16x64xf32>
    %14 = arith.mulf %13, %13 : vector<16x64xf32>
    %cst_9 = arith.constant dense<0.000000e+00> : vector<16xf32>
    %15 = vector.multi_reduction <add>, %14, %cst_9 [1] : vector<16x64xf32> to vector<16xf32>
    %16 = vector.shape_cast %15 : vector<16xf32> to vector<16x1xf32>
    %cst_10 = arith.constant 6.400000e+01 : f32
    %17 = vector.broadcast %cst_10 : f32 to vector<16x1xf32>
    %18 = arith.divf %16, %17 : vector<16x1xf32>
    %19 = vector.broadcast %11 : vector<16x1xf32> to vector<16x64xf32>
    %20 = arith.subf %3, %19 : vector<16x64xf32>
    %cst_11 = arith.constant 9.99999974E-6 : f32
    %21 = vector.broadcast %cst_11 : f32 to vector<16x1xf32>
    %22 = arith.addf %18, %21 : vector<16x1xf32>
    %23 = math.rsqrt %22 : vector<16x1xf32>
    %24 = vector.broadcast %23 : vector<16x1xf32> to vector<16x64xf32>
    %25 = arith.mulf %20, %24 : vector<16x64xf32>
    %26 = vector.broadcast %5 : vector<1x64xf32> to vector<16x64xf32>
    %27 = arith.mulf %25, %26 : vector<16x64xf32>
    %28 = vector.broadcast %7 : vector<1x64xf32> to vector<16x64xf32>
    %29 = arith.addf %27, %28 : vector<16x64xf32>
    %30 = arith.truncf %29 : vector<16x64xf32> to vector<16x64xbf16>
    %c0_12 = arith.constant 0 : index
    %c0_13 = arith.constant 0 : index
    %c0_14 = arith.constant 0 : index
    %31 = vector.load %arg7[%c0_12, %c0_13, %c0_14] : memref<1x64x192xbf16, #tpu.memory_space<vmem>>, vector<1x64x192xbf16>
    %32 = vector.shape_cast %31 : vector<1x64x192xbf16> to vector<64x192xbf16>
    %cst_15 = arith.constant dense<0.000000e+00> : vector<16x192xf32>
    %33 = tpu.matmul %30, %32, %cst_15 {dimension_numbers = #tpu.dot_dimension_numbers<[1], [0], [0], [1], [0, 0, 1, 1], [], []>} : vector<16x64xbf16>, vector<64x192xbf16>, vector<16x192xf32> -> vector<16x192xf32>
    %34 = vector.extract_strided_slice %33 {offsets = [0, 0], sizes = [16, 64], strides = [1, 1]} : vector<16x192xf32> to vector<16x64xf32>
    %cst_16 = arith.constant 2.500000e-01 : f32
    %35 = vector.broadcast %cst_16 : f32 to vector<16x64xf32>
    %36 = arith.mulf %34, %35 : vector<16x64xf32>
    %37 = arith.truncf %36 : vector<16x64xf32> to vector<16x64xbf16>
    %38 = vector.extract_strided_slice %33 {offsets = [0, 64], sizes = [16, 64], strides = [1, 1]} : vector<16x192xf32> to vector<16x64xf32>
    %39 = arith.truncf %38 : vector<16x64xf32> to vector<16x64xbf16>
    %40 = vector.extract_strided_slice %33 {offsets = [0, 128], sizes = [16, 64], strides = [1, 1]} : vector<16x192xf32> to vector<16x64xf32>
    %41 = arith.truncf %40 : vector<16x64xf32> to vector<16x64xbf16>
    %42 = vector.extract_strided_slice %37 {offsets = [0, 0], sizes = [16, 16], strides = [1, 1]} : vector<16x64xbf16> to vector<16x16xbf16>
    %43 = vector.extract_strided_slice %37 {offsets = [0, 16], sizes = [16, 16], strides = [1, 1]} : vector<16x64xbf16> to vector<16x16xbf16>
    %44 = vector.extract_strided_slice %37 {offsets = [0, 32], sizes = [16, 16], strides = [1, 1]} : vector<16x64xbf16> to vector<16x16xbf16>
    %45 = vector.extract_strided_slice %37 {offsets = [0, 48], sizes = [16, 16], strides = [1, 1]} : vector<16x64xbf16> to vector<16x16xbf16>
    %46 = vector.shape_cast %42 : vector<16x16xbf16> to vector<1x16x16xbf16>
    %47 = vector.shape_cast %43 : vector<16x16xbf16> to vector<1x16x16xbf16>
    %48 = vector.shape_cast %44 : vector<16x16xbf16> to vector<1x16x16xbf16>
    %49 = vector.shape_cast %45 : vector<16x16xbf16> to vector<1x16x16xbf16>
    %50 = tpu.concatenate %46, %47, %48, %49 in 0 : vector<1x16x16xbf16>, vector<1x16x16xbf16>, vector<1x16x16xbf16>, vector<1x16x16xbf16> -> vector<4x16x16xbf16>
    %51 = vector.extract_strided_slice %39 {offsets = [0, 0], sizes = [16, 16], strides = [1, 1]} : vector<16x64xbf16> to vector<16x16xbf16>
    %52 = vector.extract_strided_slice %39 {offsets = [0, 16], sizes = [16, 16], strides = [1, 1]} : vector<16x64xbf16> to vector<16x16xbf16>
    %53 = vector.extract_strided_slice %39 {offsets = [0, 32], sizes = [16, 16], strides = [1, 1]} : vector<16x64xbf16> to vector<16x16xbf16>
    %54 = vector.extract_strided_slice %39 {offsets = [0, 48], sizes = [16, 16], strides = [1, 1]} : vector<16x64xbf16> to vector<16x16xbf16>
    %55 = vector.shape_cast %51 : vector<16x16xbf16> to vector<1x16x16xbf16>
    %56 = vector.shape_cast %52 : vector<16x16xbf16> to vector<1x16x16xbf16>
    %57 = vector.shape_cast %53 : vector<16x16xbf16> to vector<1x16x16xbf16>
    %58 = vector.shape_cast %54 : vector<16x16xbf16> to vector<1x16x16xbf16>
    %59 = tpu.concatenate %55, %56, %57, %58 in 0 : vector<1x16x16xbf16>, vector<1x16x16xbf16>, vector<1x16x16xbf16>, vector<1x16x16xbf16> -> vector<4x16x16xbf16>
    %60 = vector.extract_strided_slice %41 {offsets = [0, 0], sizes = [16, 16], strides = [1, 1]} : vector<16x64xbf16> to vector<16x16xbf16>
    %61 = vector.extract_strided_slice %41 {offsets = [0, 16], sizes = [16, 16], strides = [1, 1]} : vector<16x64xbf16> to vector<16x16xbf16>
    %62 = vector.extract_strided_slice %41 {offsets = [0, 32], sizes = [16, 16], strides = [1, 1]} : vector<16x64xbf16> to vector<16x16xbf16>
    %63 = vector.extract_strided_slice %41 {offsets = [0, 48], sizes = [16, 16], strides = [1, 1]} : vector<16x64xbf16> to vector<16x16xbf16>
    %64 = vector.shape_cast %60 : vector<16x16xbf16> to vector<1x16x16xbf16>
    %65 = vector.shape_cast %61 : vector<16x16xbf16> to vector<1x16x16xbf16>
    %66 = vector.shape_cast %62 : vector<16x16xbf16> to vector<1x16x16xbf16>
    %67 = vector.shape_cast %63 : vector<16x16xbf16> to vector<1x16x16xbf16>
    %68 = tpu.concatenate %64, %65, %66, %67 in 0 : vector<1x16x16xbf16>, vector<1x16x16xbf16>, vector<1x16x16xbf16>, vector<1x16x16xbf16> -> vector<4x16x16xbf16>
    "tpu.trace_start"() <{level = 10 : i32, message = "xnd,xmd->xnm"}> : () -> ()
    %cst_17 = arith.constant dense<0.000000e+00> : vector<4x16x16xf32>
    %69 = tpu.matmul %50, %59, %cst_17 {dimension_numbers = #tpu.dot_dimension_numbers<[2], [2], [1], [1], [0, 0, 0, 1, 1, 1], [0], [0]>} : vector<4x16x16xbf16>, vector<4x16x16xbf16>, vector<4x16x16xf32> -> vector<4x16x16xf32>
    "tpu.trace_stop"() : () -> ()
    %cst_18 = arith.constant dense<0xFF800000> : vector<4x16xf32>
    %70 = vector.multi_reduction <maximumf>, %69, %cst_18 [2] : vector<4x16x16xf32> to vector<4x16xf32>
    %71 = vector.shape_cast %70 : vector<4x16xf32> to vector<4x16x1xf32>
    %72 = vector.broadcast %71 : vector<4x16x1xf32> to vector<4x16x16xf32>
    %73 = arith.subf %69, %72 : vector<4x16x16xf32>
    %74 = math.exp %73 : vector<4x16x16xf32>
    %cst_19 = arith.constant dense<0.000000e+00> : vector<4x16xf32>
    %75 = vector.multi_reduction <add>, %74, %cst_19 [2] : vector<4x16x16xf32> to vector<4x16xf32>
    %76 = vector.shape_cast %75 : vector<4x16xf32> to vector<4x16x1xf32>
    %77 = tpu.reciprocal %76 {approx = true} : vector<4x16x1xf32> -> vector<4x16x1xf32>
    %78 = vector.broadcast %77 : vector<4x16x1xf32> to vector<4x16x16xf32>
    %79 = arith.mulf %74, %78 : vector<4x16x16xf32>
    %80 = arith.truncf %79 : vector<4x16x16xf32> to vector<4x16x16xbf16>
    "tpu.trace_start"() <{level = 10 : i32, message = "xnm,xmd->xnd"}> : () -> ()
    %cst_20 = arith.constant dense<0.000000e+00> : vector<4x16x16xf32>
    %81 = tpu.matmul %80, %68, %cst_20 {dimension_numbers = #tpu.dot_dimension_numbers<[2], [1], [1], [2], [0, 0, 0, 1, 1, 2], [0], [0]>} : vector<4x16x16xbf16>, vector<4x16x16xbf16>, vector<4x16x16xf32> -> vector<4x16x16xf32>
    "tpu.trace_stop"() : () -> ()
    %82 = vector.extract_strided_slice %81 {offsets = [0, 0, 0], sizes = [1, 16, 16], strides = [1, 1, 1]} : vector<4x16x16xf32> to vector<1x16x16xf32>
    %83 = vector.shape_cast %82 : vector<1x16x16xf32> to vector<16x16xf32>
    %84 = vector.extract_strided_slice %81 {offsets = [1, 0, 0], sizes = [1, 16, 16], strides = [1, 1, 1]} : vector<4x16x16xf32> to vector<1x16x16xf32>
    %85 = vector.shape_cast %84 : vector<1x16x16xf32> to vector<16x16xf32>
    %86 = vector.extract_strided_slice %81 {offsets = [2, 0, 0], sizes = [1, 16, 16], strides = [1, 1, 1]} : vector<4x16x16xf32> to vector<1x16x16xf32>
    %87 = vector.shape_cast %86 : vector<1x16x16xf32> to vector<16x16xf32>
    %88 = vector.extract_strided_slice %81 {offsets = [3, 0, 0], sizes = [1, 16, 16], strides = [1, 1, 1]} : vector<4x16x16xf32> to vector<1x16x16xf32>
    %89 = vector.shape_cast %88 : vector<1x16x16xf32> to vector<16x16xf32>
    %90 = tpu.concatenate %83, %85, %87, %89 in 1 : vector<16x16xf32>, vector<16x16xf32>, vector<16x16xf32>, vector<16x16xf32> -> vector<16x64xf32>
    %91 = arith.truncf %90 : vector<16x64xf32> to vector<16x64xbf16>
    %c0_21 = arith.constant 0 : index
    %c0_22 = arith.constant 0 : index
    %c0_23 = arith.constant 0 : index
    %92 = vector.load %arg8[%c0_21, %c0_22, %c0_23] : memref<1x64x64xbf16, #tpu.memory_space<vmem>>, vector<1x64x64xbf16>
    %93 = vector.shape_cast %92 : vector<1x64x64xbf16> to vector<64x64xbf16>
    %cst_24 = arith.constant dense<0.000000e+00> : vector<16x64xf32>
    %94 = tpu.matmul %91, %93, %cst_24 {dimension_numbers = #tpu.dot_dimension_numbers<[1], [0], [0], [1], [0, 0, 1, 1], [], []>} : vector<16x64xbf16>, vector<64x64xbf16>, vector<16x64xf32> -> vector<16x64xf32>
    %95 = arith.addf %3, %94 : vector<16x64xf32>
    %c0_25 = arith.constant 0 : index
    %c0_26 = arith.constant 0 : index
    %c0_27 = arith.constant 0 : index
    %96 = vector.load %arg9[%c0_25, %c0_26, %c0_27] : memref<1x1x64xf32, #tpu.memory_space<vmem>>, vector<1x1x64xf32>
    %97 = vector.shape_cast %96 : vector<1x1x64xf32> to vector<1x64xf32>
    %98 = vector.broadcast %97 : vector<1x64xf32> to vector<16x64xf32>
    %99 = arith.addf %95, %98 : vector<16x64xf32>
    %c0_28 = arith.constant 0 : index
    %c0_29 = arith.constant 0 : index
    %c0_30 = arith.constant 0 : index
    %100 = vector.load %arg10[%c0_28, %c0_29, %c0_30] : memref<1x1x64xf32, #tpu.memory_space<vmem>>, vector<1x1x64xf32>
    %101 = vector.shape_cast %100 : vector<1x1x64xf32> to vector<1x64xf32>
    %c0_31 = arith.constant 0 : index
    %c0_32 = arith.constant 0 : index
    %c0_33 = arith.constant 0 : index
    %102 = vector.load %arg11[%c0_31, %c0_32, %c0_33] : memref<1x1x64xf32, #tpu.memory_space<vmem>>, vector<1x1x64xf32>
    %103 = vector.shape_cast %102 : vector<1x1x64xf32> to vector<1x64xf32>
    %cst_34 = arith.constant dense<0.000000e+00> : vector<16xf32>
    %104 = vector.multi_reduction <add>, %99, %cst_34 [1] : vector<16x64xf32> to vector<16xf32>
    %105 = vector.shape_cast %104 : vector<16xf32> to vector<16x1xf32>
    %cst_35 = arith.constant 6.400000e+01 : f32
    %106 = vector.broadcast %cst_35 : f32 to vector<16x1xf32>
    %107 = arith.divf %105, %106 : vector<16x1xf32>
    %108 = vector.broadcast %107 : vector<16x1xf32> to vector<16x64xf32>
    %109 = arith.subf %99, %108 : vector<16x64xf32>
    %110 = arith.mulf %109, %109 : vector<16x64xf32>
    %cst_36 = arith.constant dense<0.000000e+00> : vector<16xf32>
    %111 = vector.multi_reduction <add>, %110, %cst_36 [1] : vector<16x64xf32> to vector<16xf32>
    %112 = vector.shape_cast %111 : vector<16xf32> to vector<16x1xf32>
    %cst_37 = arith.constant 6.400000e+01 : f32
    %113 = vector.broadcast %cst_37 : f32 to vector<16x1xf32>
    %114 = arith.divf %112, %113 : vector<16x1xf32>
    %115 = vector.broadcast %107 : vector<16x1xf32> to vector<16x64xf32>
    %116 = arith.subf %99, %115 : vector<16x64xf32>
    %cst_38 = arith.constant 9.99999974E-6 : f32
    %117 = vector.broadcast %cst_38 : f32 to vector<16x1xf32>
    %118 = arith.addf %114, %117 : vector<16x1xf32>
    %119 = math.rsqrt %118 : vector<16x1xf32>
    %120 = vector.broadcast %119 : vector<16x1xf32> to vector<16x64xf32>
    %121 = arith.mulf %116, %120 : vector<16x64xf32>
    %122 = vector.broadcast %101 : vector<1x64xf32> to vector<16x64xf32>
    %123 = arith.mulf %121, %122 : vector<16x64xf32>
    %124 = vector.broadcast %103 : vector<1x64xf32> to vector<16x64xf32>
    %125 = arith.addf %123, %124 : vector<16x64xf32>
    %126 = arith.truncf %125 : vector<16x64xf32> to vector<16x64xbf16>
    %c0_39 = arith.constant 0 : index
    %c0_40 = arith.constant 0 : index
    %c0_41 = arith.constant 0 : index
    %127 = vector.load %arg12[%c0_39, %c0_40, %c0_41] : memref<1x64x128xbf16, #tpu.memory_space<vmem>>, vector<1x64x128xbf16>
    %128 = vector.shape_cast %127 : vector<1x64x128xbf16> to vector<64x128xbf16>
    %cst_42 = arith.constant dense<0.000000e+00> : vector<16x128xf32>
    %129 = tpu.matmul %126, %128, %cst_42 {dimension_numbers = #tpu.dot_dimension_numbers<[1], [0], [0], [1], [0, 0, 1, 1], [], []>} : vector<16x64xbf16>, vector<64x128xbf16>, vector<16x128xf32> -> vector<16x128xf32>
    %c0_43 = arith.constant 0 : index
    %c0_44 = arith.constant 0 : index
    %c0_45 = arith.constant 0 : index
    %130 = vector.load %arg13[%c0_43, %c0_44, %c0_45] : memref<1x1x128xf32, #tpu.memory_space<vmem>>, vector<1x1x128xf32>
    %131 = vector.shape_cast %130 : vector<1x1x128xf32> to vector<1x128xf32>
    %132 = vector.broadcast %131 : vector<1x128xf32> to vector<16x128xf32>
    %133 = arith.addf %129, %132 : vector<16x128xf32>
    %cst_46 = arith.constant 5.000000e-01 : f32
    %134 = vector.broadcast %cst_46 : f32 to vector<16x128xf32>
    %135 = arith.mulf %134, %133 : vector<16x128xf32>
    %cst_47 = arith.constant 4.471500e-02 : f32
    %136 = vector.broadcast %cst_47 : f32 to vector<16x128xf32>
    %137 = arith.mulf %136, %133 : vector<16x128xf32>
    %138 = arith.mulf %137, %133 : vector<16x128xf32>
    %139 = arith.mulf %138, %133 : vector<16x128xf32>
    %140 = arith.addf %133, %139 : vector<16x128xf32>
    %cst_48 = arith.constant 0.797884583 : f32
    %141 = vector.broadcast %cst_48 : f32 to vector<16x128xf32>
    %142 = arith.mulf %141, %140 : vector<16x128xf32>
    %143 = math.tanh %142 : vector<16x128xf32>
    %cst_49 = arith.constant 1.000000e+00 : f32
    %144 = vector.broadcast %cst_49 : f32 to vector<16x128xf32>
    %145 = arith.addf %144, %143 : vector<16x128xf32>
    %146 = arith.mulf %135, %145 : vector<16x128xf32>
    %147 = arith.truncf %146 : vector<16x128xf32> to vector<16x128xbf16>
    %c0_50 = arith.constant 0 : index
    %c0_51 = arith.constant 0 : index
    %c0_52 = arith.constant 0 : index
    %148 = vector.load %arg14[%c0_50, %c0_51, %c0_52] : memref<1x128x64xbf16, #tpu.memory_space<vmem>>, vector<1x128x64xbf16>
    %149 = vector.shape_cast %148 : vector<1x128x64xbf16> to vector<128x64xbf16>
    %cst_53 = arith.constant dense<0.000000e+00> : vector<16x64xf32>
    %150 = tpu.matmul %147, %149, %cst_53 {dimension_numbers = #tpu.dot_dimension_numbers<[1], [0], [0], [1], [0, 0, 1, 1], [], []>} : vector<16x128xbf16>, vector<128x64xbf16>, vector<16x64xf32> -> vector<16x64xf32>
    %c0_54 = arith.constant 0 : index
    %c0_55 = arith.constant 0 : index
    %c0_56 = arith.constant 0 : index
    %151 = vector.load %arg15[%c0_54, %c0_55, %c0_56] : memref<1x1x64xf32, #tpu.memory_space<vmem>>, vector<1x1x64xf32>
    %152 = vector.shape_cast %151 : vector<1x1x64xf32> to vector<1x64xf32>
    %153 = vector.broadcast %152 : vector<1x64xf32> to vector<16x64xf32>
    %154 = arith.addf %150, %153 : vector<16x64xf32>
    %155 = arith.addf %99, %154 : vector<16x64xf32>
    %c0_57 = arith.constant 0 : index
    %c0_58 = arith.constant 0 : index
    %156 = vector.load %arg21[%c0_57, %c0_58] : memref<16x64xf32, #tpu.memory_space<vmem>>, vector<16x64xf32>
    tpu.vector_store %arg21[%c0_57, %c0_58], %155 {strides = array<i32>} : memref<16x64xf32, #tpu.memory_space<vmem>>, vector<16x64xf32>,
    %c1_i32 = arith.constant 1 : i32
    %157 = arith.cmpi eq, %arg1, %c1_i32 : i32
    %158 = arith.extui %157 : i1 to i32
    %c0_i32_59 = arith.constant 0 : i32
    %159 = arith.cmpi ne, %158, %c0_i32_59 : i32
    scf.if %159 {
      %c0_60 = arith.constant 0 : index
      %c0_61 = arith.constant 0 : index
      %160 = vector.load %arg16[%c0_60, %c0_61] : memref<1x64xf32, #tpu.memory_space<vmem>>, vector<1x64xf32>
      %c0_62 = arith.constant 0 : index
      %c0_63 = arith.constant 0 : index
      %161 = vector.load %arg17[%c0_62, %c0_63] : memref<1x64xf32, #tpu.memory_space<vmem>>, vector<1x64xf32>
      %cst_64 = arith.constant dense<0.000000e+00> : vector<16xf32>
      %162 = vector.multi_reduction <add>, %155, %cst_64 [1] : vector<16x64xf32> to vector<16xf32>
      %163 = vector.shape_cast %162 : vector<16xf32> to vector<16x1xf32>
      %cst_65 = arith.constant 6.400000e+01 : f32
      %164 = vector.broadcast %cst_65 : f32 to vector<16x1xf32>
      %165 = arith.divf %163, %164 : vector<16x1xf32>
      %166 = vector.broadcast %165 : vector<16x1xf32> to vector<16x64xf32>
      %167 = arith.subf %155, %166 : vector<16x64xf32>
      %168 = arith.mulf %167, %167 : vector<16x64xf32>
      %cst_66 = arith.constant dense<0.000000e+00> : vector<16xf32>
      %169 = vector.multi_reduction <add>, %168, %cst_66 [1] : vector<16x64xf32> to vector<16xf32>
      %170 = vector.shape_cast %169 : vector<16xf32> to vector<16x1xf32>
      %cst_67 = arith.constant 6.400000e+01 : f32
      %171 = vector.broadcast %cst_67 : f32 to vector<16x1xf32>
      %172 = arith.divf %170, %171 : vector<16x1xf32>
      %173 = vector.broadcast %165 : vector<16x1xf32> to vector<16x64xf32>
      %174 = arith.subf %155, %173 : vector<16x64xf32>
      %cst_68 = arith.constant 9.99999974E-6 : f32
      %175 = vector.broadcast %cst_68 : f32 to vector<16x1xf32>
      %176 = arith.addf %172, %175 : vector<16x1xf32>
      %177 = math.rsqrt %176 : vector<16x1xf32>
      %178 = vector.broadcast %177 : vector<16x1xf32> to vector<16x64xf32>
      %179 = arith.mulf %174, %178 : vector<16x64xf32>
      %180 = vector.broadcast %160 : vector<1x64xf32> to vector<16x64xf32>
      %181 = arith.mulf %179, %180 : vector<16x64xf32>
      %182 = vector.broadcast %161 : vector<1x64xf32> to vector<16x64xf32>
      %183 = arith.addf %181, %182 : vector<16x64xf32>
      %184 = arith.truncf %183 : vector<16x64xf32> to vector<16x64xbf16>
      %c0_69 = arith.constant 0 : index
      %c0_70 = arith.constant 0 : index
      %185 = vector.load %arg18[%c0_69, %c0_70] : memref<64x128xbf16, #tpu.memory_space<vmem>>, vector<64x128xbf16>
      %cst_71 = arith.constant dense<0.000000e+00> : vector<16x128xf32>
      %186 = tpu.matmul %184, %185, %cst_71 {dimension_numbers = #tpu.dot_dimension_numbers<[1], [0], [0], [1], [0, 0, 1, 1], [], []>} : vector<16x64xbf16>, vector<64x128xbf16>, vector<16x128xf32> -> vector<16x128xf32>
      %c0_72 = arith.constant 0 : index
      %c0_73 = arith.constant 0 : index
      %187 = vector.load %arg19[%c0_72, %c0_73] : memref<1x128xf32, #tpu.memory_space<vmem>>, vector<1x128xf32>
      %188 = vector.broadcast %187 : vector<1x128xf32> to vector<16x128xf32>
      %189 = arith.addf %186, %188 : vector<16x128xf32>
      %c0_74 = arith.constant 0 : index
      %c0_75 = arith.constant 0 : index
      %190 = vector.load %arg20[%c0_74, %c0_75] : memref<16x128xf32, #tpu.memory_space<vmem>>, vector<16x128xf32>
      tpu.vector_store %arg20[%c0_74, %c0_75], %189 {strides = array<i32>} : memref<16x128xf32, #tpu.memory_space<vmem>>, vector<16x128xf32>,
    } else {
    }
    return
  }
  func.func @transform_0(%arg0: i32, %arg1: i32) -> (i32, i32) {
    %c0_i32 = arith.constant 0 : i32
    %c0_i32_0 = arith.constant 0 : i32
    return %arg0, %c0_i32 : i32, i32
  }
  func.func @transform_1(%arg0: i32, %arg1: i32) -> (i32, i32) {
    %c0_i32 = arith.constant 0 : i32
    %c0_i32_0 = arith.constant 0 : i32
    %c0_i32_1 = arith.constant 0 : i32
    return %c0_i32, %c0_i32_0 : i32, i32
  }
  func.func @transform_2(%arg0: i32, %arg1: i32) -> (i32, i32) {
    %c0_i32 = arith.constant 0 : i32
    %c0_i32_0 = arith.constant 0 : i32
    %c0_i32_1 = arith.constant 0 : i32
    return %c0_i32, %c0_i32_0 : i32, i32
  }
  func.func @transform_3(%arg0: i32, %arg1: i32) -> (i32, i32, i32) {
    %c0_i32 = arith.constant 0 : i32
    %c0_i32_0 = arith.constant 0 : i32
    %c0_i32_1 = arith.constant 0 : i32
    return %arg1, %c0_i32, %c0_i32_0 : i32, i32, i32
  }
  func.func @transform_4(%arg0: i32, %arg1: i32) -> (i32, i32, i32) {
    %c0_i32 = arith.constant 0 : i32
    %c0_i32_0 = arith.constant 0 : i32
    %c0_i32_1 = arith.constant 0 : i32
    return %arg1, %c0_i32, %c0_i32_0 : i32, i32, i32
  }
  func.func @transform_5(%arg0: i32, %arg1: i32) -> (i32, i32, i32) {
    %c0_i32 = arith.constant 0 : i32
    %c0_i32_0 = arith.constant 0 : i32
    %c0_i32_1 = arith.constant 0 : i32
    return %arg1, %c0_i32, %c0_i32_0 : i32, i32, i32
  }
  func.func @transform_6(%arg0: i32, %arg1: i32) -> (i32, i32, i32) {
    %c0_i32 = arith.constant 0 : i32
    %c0_i32_0 = arith.constant 0 : i32
    %c0_i32_1 = arith.constant 0 : i32
    return %arg1, %c0_i32, %c0_i32_0 : i32, i32, i32
  }
  func.func @transform_7(%arg0: i32, %arg1: i32) -> (i32, i32, i32) {
    %c0_i32 = arith.constant 0 : i32
    %c0_i32_0 = arith.constant 0 : i32
    %c0_i32_1 = arith.constant 0 : i32
    return %arg1, %c0_i32, %c0_i32_0 : i32, i32, i32
  }
  func.func @transform_8(%arg0: i32, %arg1: i32) -> (i32, i32, i32) {
    %c0_i32 = arith.constant 0 : i32
    %c0_i32_0 = arith.constant 0 : i32
    %c0_i32_1 = arith.constant 0 : i32
    return %arg1, %c0_i32, %c0_i32_0 : i32, i32, i32
  }
  func.func @transform_9(%arg0: i32, %arg1: i32) -> (i32, i32, i32) {
    %c0_i32 = arith.constant 0 : i32
    %c0_i32_0 = arith.constant 0 : i32
    %c0_i32_1 = arith.constant 0 : i32
    return %arg1, %c0_i32, %c0_i32_0 : i32, i32, i32
  }
  func.func @transform_10(%arg0: i32, %arg1: i32) -> (i32, i32, i32) {
    %c0_i32 = arith.constant 0 : i32
    %c0_i32_0 = arith.constant 0 : i32
    %c0_i32_1 = arith.constant 0 : i32
    return %arg1, %c0_i32, %c0_i32_0 : i32, i32, i32
  }
  func.func @transform_11(%arg0: i32, %arg1: i32) -> (i32, i32, i32) {
    %c0_i32 = arith.constant 0 : i32
    %c0_i32_0 = arith.constant 0 : i32
    %c0_i32_1 = arith.constant 0 : i32
    return %arg1, %c0_i32, %c0_i32_0 : i32, i32, i32
  }
  func.func @transform_12(%arg0: i32, %arg1: i32) -> (i32, i32, i32) {
    %c0_i32 = arith.constant 0 : i32
    %c0_i32_0 = arith.constant 0 : i32
    %c0_i32_1 = arith.constant 0 : i32
    return %arg1, %c0_i32, %c0_i32_0 : i32, i32, i32
  }
  func.func @transform_13(%arg0: i32, %arg1: i32) -> (i32, i32, i32) {
    %c0_i32 = arith.constant 0 : i32
    %c0_i32_0 = arith.constant 0 : i32
    %c0_i32_1 = arith.constant 0 : i32
    return %arg1, %c0_i32, %c0_i32_0 : i32, i32, i32
  }
  func.func @transform_14(%arg0: i32, %arg1: i32) -> (i32, i32) {
    %c0_i32 = arith.constant 0 : i32
    %c0_i32_0 = arith.constant 0 : i32
    %c0_i32_1 = arith.constant 0 : i32
    return %c0_i32, %c0_i32_0 : i32, i32
  }
  func.func @transform_15(%arg0: i32, %arg1: i32) -> (i32, i32) {
    %c0_i32 = arith.constant 0 : i32
    %c0_i32_0 = arith.constant 0 : i32
    %c0_i32_1 = arith.constant 0 : i32
    return %c0_i32, %c0_i32_0 : i32, i32
  }
  func.func @transform_16(%arg0: i32, %arg1: i32) -> (i32, i32) {
    %c0_i32 = arith.constant 0 : i32
    %c0_i32_0 = arith.constant 0 : i32
    %c0_i32_1 = arith.constant 0 : i32
    return %c0_i32, %c0_i32_0 : i32, i32
  }
  func.func @transform_17(%arg0: i32, %arg1: i32) -> (i32, i32) {
    %c0_i32 = arith.constant 0 : i32
    %c0_i32_0 = arith.constant 0 : i32
    %c0_i32_1 = arith.constant 0 : i32
    return %c0_i32, %c0_i32_0 : i32, i32
  }
  func.func @transform_18(%arg0: i32, %arg1: i32) -> (i32, i32) {
    %c0_i32 = arith.constant 0 : i32
    %c0_i32_0 = arith.constant 0 : i32
    return %arg0, %c0_i32 : i32, i32
  }
}

</mosaic_0001>

<bundles_post_ra>
// kernel: vit_forward.1
= control target key start
LH: loop header
LB: loop body
LE: loop exit
PB: predicated region body
PF: predicated region fallthrough
CT: control target
= control target key end

     0   :  { %s2417_s27 = smov 0   ;;  %s2419_s28 = smov 0   ;;  %s2784_s0 = inlined_call_operand.vmem [shape: bf16[32,64], index: 0, kind: input, shape index: {}]   ;;  %s2785_s1 = inlined_call_operand.vmem [shape: bf16[64,64], index: 1, kind: input, shape index: {}]   ;;  %s2786_s2 = inlined_call_operand.vmem [shape: f32[1,64], index: 2, kind: input, shape index: {}]   ;;  %s2787_s3 = inlined_call_operand.vmem [shape: f32[2,1,64], index: 3, kind: input, shape index: {}]   ;;  %s2788_s4 = inlined_call_operand.vmem [shape: f32[2,1,64], index: 4, kind: input, shape index: {}]   ;;  %s2789_s5 = inlined_call_operand.vmem [shape: bf16[2,64,192], index: 5, kind: input, shape index: {}]   ;;  %s2790_s6 = inlined_call_operand.vmem [shape: bf16[2,64,64], index: 6, kind: input, shape index: {}]   ;;  %s2791_s7 = inlined_call_operand.vmem [shape: f32[2,1,64], index: 7, kind: input, shape index: {}]   ;;  %s2792_s8 = inlined_call_operand.vmem [shape: f32[2,1,64], index: 8, kind: input, shape index: {}]   ;;  %s2793_s9 = inlined_call_operand.vmem [shape: f32[2,1,64], index: 9, kind: input, shape index: {}]   ;;  %s2794_s10 = inlined_call_operand.vmem [shape: bf16[2,64,128], index: 10, kind: input, shape index: {}]   ;;  %s2795_s11 = inlined_call_operand.vmem [shape: f32[2,1,128], index: 11, kind: input, shape index: {}]   ;;  %s2796_s12 = inlined_call_operand.vmem [shape: bf16[2,128,64], index: 12, kind: input, shape index: {}]   ;;  %s2797_s13 = inlined_call_operand.vmem [shape: f32[2,1,64], index: 13, kind: input, shape index: {}]   ;;  %s2798_s14 = inlined_call_operand.vmem [shape: f32[1,64], index: 14, kind: input, shape index: {}]   ;;  %s2799_s15 = inlined_call_operand.vmem [shape: f32[1,64], index: 15, kind: input, shape index: {}]   ;;  %s2800_s16 = inlined_call_operand.vmem [shape: bf16[64,128], index: 16, kind: input, shape index: {}]   ;;  %s2801_s17 = inlined_call_operand.vmem [shape: f32[1,128], index: 17, kind: input, shape index: {}]   ;;  %s2802_s18 = inlined_call_operand.vmem [shape: f32[32,128], index: 18, kind: output, shape index: {}]  }
   0x1   :  { %2809 = sst [smem:[#allocation9_spill]] %s2784_s0  ;;  %s2421_s29 = smov 0  }
   0x2   :  { %2810 = sst [smem:[#allocation10_spill]] %s2785_s1  ;;  %s2423_s30 = smov 0  }
   0x3   :  { %2811 = sst [smem:[#allocation11_spill]] %s2786_s2  ;;  %s2425_s0 = smov 0  }
   0x4   :  { %2812 = sst [smem:[#allocation12_spill]] %s2789_s5 }
   0x5   :  { %2813 = sst [smem:[#allocation13_spill]] %s2790_s6 }
   0x6   :  { %2814 = sst [smem:[#allocation14_spill]] %s2793_s9 }
   0x7   :  { %2815 = sst [smem:[#allocation15_spill]] %s2798_s14 }
   0x8   :  { %2816 = sst [smem:[#allocation16_spill]] %s2799_s15 }
   0x9   :  { %2817 = sst [smem:[#allocation17_spill]] %s2800_s16 }
   0xa   :  { %2818 = sst [smem:[#allocation18_spill]] %s2801_s17 }
   0xb   :  { %2819 = sst [smem:[#allocation19_spill]] %s2802_s18 }
   0xc LB: > { %2820 = sst [smem:[#allocation3_spill]] %s2296_s27  ;;  %s37_s19 = sadd.s32 1, %s2304_s29  ;;  %s2312_s0 = sphi %s2425_s0, %s28_s0   ;;  %s2308_s30 = sphi %s2423_s30, %s2851_s30   ;;  %s2304_s29 = sphi %s2421_s29, %s2850_s29   ;;  %s2300_s28 = sphi %s2419_s28, %s2849_s28   ;;  %s2296_s27 = sphi %s2417_s27, %s2848_s27  }
   0xd   : > { %2821 = sst [smem:[#allocation4_spill]] %s2304_s29  ;;  %s40_s1 = sadd.s32 1, %s2308_s30 }
   0xe   : > { %2822 = sst [smem:[#allocation5_spill]] %s2308_s30  ;;  %p38_p0 = scmp.ge.s32.totalorder %s37_s19, 2 }
   0xf   : > { %2823 = sst [smem:[#allocation6_spill]] %s2312_s0  ;;  %p1950_p1 = scmp.ge.s32.totalorder %s2312_s0, 1 }
  0x10   : > { %p621_p2 = scmp.lt.s32.totalorder %s2312_s0, 5  ;;  %s2853_s19 = smov (%p38_p0, %s37_s19), 0 }
  0x11   : > { %2824 = sst [smem:[#allocation7_spill]] %s2853_s19  ;;  %s2855_s1 = smov (!%p38_p0, %s40_s1), %s2308_s30 }
  0x12   : > { %p622_p3 = pnand %p1950_p1, %p621_p2  ;;  %p42_p4 = scmp.ge.s32.totalorder %s2855_s1, 2 }
  0x13   : > { %s1951_s20 = sshll.u32 (!%p622_p3), %s2300_s28, 1  ;;  %p722_p5 = scmp.lt.s32.totalorder (!%p622_p3), %s2296_s27, 1 }
  0x14   : > { %s2857_s1 = smov (%p42_p4, %s2855_s1), 0  ;;  %625 = sbr.rel (%p622_p3) target bundleno = 2651 (0xa5b), region = 92 }
  0x15   : > { %2825 = sst [smem:[#allocation8_spill]] %s2857_s1  ;;  %p717_p6 = scmp.lt.s32.totalorder (!%p622_p3), %s1951_s20, 3 }
  0x16   : > { %s2826_s29 = sld [smem:[#allocation9_spill]] (!%p622_p3) }
  0x17   : > { %s2827_s5 = sld [smem:[#allocation12_spill]] (!%p622_p3) }
  0x18   : > { %s2828_s6 = sld [smem:[#allocation13_spill]] (!%p622_p3) }
  0x19   : > { %s2451_s21 = scalar_select %p722_p5, %s2296_s27, 1 }
  0x1a   : > { %s2859_s20 = smov (!%p717_p6, %s1951_s20), 3  ;;  %s2830_s9 = sld [smem:[#allocation19_spill]] }
  0x1b   : > { %s1952_s28 = sshll.u32 %s2859_s20, 2  ;;  %s2113_s1 = sshll.u32 %s2451_s21, 6 }
  0x1c   : > { %s720_s0 = scalar_lea.vmem %s2826_s29, %s1952_s28  ;;  %s2114_s16 = sshll.u32 %s2451_s21, 5 }
  0x1d   : > { %s2468_s14 = scalar_lea.vmem %s2827_s5, %s2113_s1  ;;  %s2491_s5 = scalar_lea.vmem %s2794_s10, %s2114_s16 }
  0x1e   : > { %s2478_s24 = scalar_lea.vmem %s2828_s6, %s2114_s16  ;;  %s2500_s6 = scalar_lea.vmem %s2796_s12, %s2113_s1 }
  0x1f   : > { %s762_s30 = scalar_lea.vmem %s2797_s13, %s2451_s21  ;;  %s1962_s29 = sshll.u32 %s2859_s20, 3 }
  0x20   : > { %s2509_s17 = scalar_lea.vmem %s2830_s9, %s1962_s29  ;;  %s2831_s16 = sld [smem:[#allocation3_spill]] }
  0x26   : > { %p1963_p7 = scmp.ne.s32.totalorder %s2831_s16, 0 }
  0x27   : > { %s2832_s27 = sld [smem:[#allocation10_spill]] (!%p1963_p7) }
  0x28   : > { %773 = sbr.rel (%p1963_p7) target bundleno = 198 (0xc6), region = 96  ;;  %s2834_s29 = sld [smem:[#allocation11_spill]] (!%p1963_p7) }
  0x2d   : > { %s2833_s22 = smov %s2832_s27  ;;  %v2121_v0 = vld [vmem:[%s2832_s27 + $0x18] sm:$0xff]  ;;  %v2117_v4 = vld [vmem:[%s720_s0] sm:$0xff]  ;;  %vm817_vm0 = vcmask 523264  }
  0x2e   : > { %825 = vmatpush.bf16.msra.mxu0 %v2121_v0  ;;  %v2120_v1 = vld [vmem:[%s2833_s22 + $0x10] sm:$0xff]  ;;  %v2119_v2 = vld [vmem:[%s2833_s22 + $0x8] sm:$0xff]  ;;  %v2118_v3 = vld [vmem:[%s2833_s22] sm:$0xff] }
  0x2f   : > { %v2198_v5 = vld [vmem:[%s2834_s29] ss:$0 sm:$0xff] }
  0x32   : > { %826 = vmatpush.bf16.msra.mxu0 %v2120_v1 }
  0x36   : > { %827 = vmatpush.bf16.msra.mxu0 %v2119_v2 }
  0x3a   : > { %828 = vmatpush.bf16.msra.mxu0 %v2118_v3 }
  0x3d   : > { %1984 = vmatmul.msk.bf16.vlgmr.msra.gmra.mxu0 %vm817_vm0, %v2117_v4 }
  0xba   : > { %v830_v6 = vpop.f32.mrf.mxu0 }
  0xbb   : > { %v831_v7 = vadd.f32 %v2198_v5, %v830_v6 }
  0xbd   : > { %835 = vst.msk [vmem:[#allocation2] sm:$0xff] %vm817_vm0, %v831_v7 }
  0xc2   : > { %v832_v8 = vpop.f32.mrf.mxu0 }
  0xc3   : > { %v833_v9 = vadd.f32 %v2198_v5, %v832_v8 }
  0xc5   : > { %836 = vst.msk [vmem:[#allocation2 + $0x8] sm:$0xff] %vm817_vm0, %v833_v9 }
  0xc6 PF: > { %v2527_v10 = vld [vmem:[#allocation2] sm:$0xff]  ;;  %vm841_vm1 = vcmask 523264   ;;  %v2314_v14 = vmov 64.0   ;;  %v2011_v31 = vld [vmem:[%s2468_s14 + $0x30] sm:$0xf]  ;;  %s2835_s19 = scalar_lea.vmem %s2787_s3, %s2451_s21  ;;  %s2836_s18 = scalar_lea.vmem %s2788_s4, %s2451_s21  ;;  %vm1041_vm9 = vcmask 130048  }
  0xc7   : > { %v842_v11 = vsel %vm841_vm1, %v2527_v10, 0.0  ;;  %2221 = vrcp.f32 %v2314_v14  ;;  %v2129_v32 = vld [vmem:[%s2468_s14 + $0x34] sm:$0xf0]  ;;  %v2128_v33 = vld [vmem:[%s2468_s14 + $0x34] sm:$0xf]  ;;  %s2315_s27 = smov 96   ;;  %s2837_s25 = scalar_lea.vmem %s2791_s7, %s2451_s21 }
  0xc8   : > { %843 = vadd.xlane.f32.xlu0 %v842_v11  ;;  %v2012_v34 = vor.u32 %v2129_v32, %v2011_v31  ;;  %v2013_v35 = vld [vmem:[%s2468_s14 + $0x38] sm:$0xf0]  ;;  %v2003_v37 = vld [vmem:[%s2468_s14 + $0x20] sm:$0xf]  ;;  %v2127_v38 = vld [vmem:[%s2468_s14 + $0x24] sm:$0xf0] }
  0xc9   : > { %v2016_v36 = vor.u32 %v2128_v33, %v2013_v35  ;;  %v2126_v39 = vld [vmem:[%s2468_s14 + $0x24] sm:$0xf]  ;;  %v2004_v40 = vor.u32 %v2127_v38, %v2003_v37  ;;  %v2005_v41 = vld [vmem:[%s2468_s14 + $0x28] sm:$0xf0]  ;;  %v1995_v43 = vld [vmem:[%s2468_s14 + $0x10] sm:$0xf] }
  0xca   : > { %959 = vmatpush.bf16.msra.mxu0 %v2012_v34  ;;  %v2008_v42 = vor.u32 %v2126_v39, %v2005_v41  ;;  %v2125_v44 = vld [vmem:[%s2468_s14 + $0x14] sm:$0xf0]  ;;  %v2124_v45 = vld [vmem:[%s2468_s14 + $0x14] sm:$0xf]  ;;  %v1997_v47 = vld [vmem:[%s2468_s14 + $0x18] sm:$0xf0] }
  0xcb   : > { %973 = vmatpush.bf16.msra.mxu1 %v2016_v36  ;;  %v1996_v46 = vor.u32 %v2125_v44, %v1995_v43  ;;  %v2000_v48 = vor.u32 %v2124_v45, %v1997_v47  ;;  %v1987_v49 = vld [vmem:[%s2468_s14] sm:$0xf]  ;;  %v2123_v50 = vld [vmem:[%s2468_s14 + $0x4] sm:$0xf0]  ;;  %v2122_v51 = vld [vmem:[%s2468_s14 + $0x4] sm:$0xf] }
  0xcc   : > { %v2531_v12 = vld [vmem:[#allocation2 + $0x8] sm:$0xff]  ;;  %v1988_v53 = vor.u32 %v2123_v50, %v1987_v49  ;;  %v2214_v11 = vld [vmem:[%s2835_s19] ss:$0 sm:$0xff]  ;;  %s2316_s1 = smov 112   ;;  %s2317_s23 = smov 80   ;;  %vm1372_vm10 = vcmask 261120  }
  0xcd   : > { %v845_v13 = vsel %vm841_vm1, %v2531_v12, 0.0  ;;  %v2222_v15 = vpop.eup %2221  ;;  %v1989_v54 = vld [vmem:[%s2468_s14 + $0x8] sm:$0xf0]  ;;  %s2318_s2 = smov 64   ;;  %s2319_s20 = smov 16   ;;  %vm1375_vm11 = vcmask 392192  }
  0xce   : > { %v849_v16 = vmul.f32 64.0, %v2222_v15  ;;  %vm853_vm2 = vweird.f32 %v2222_v15  ;;  %960 = vmatpush.bf16.msra.mxu0 %v2004_v40  ;;  %v1992_v56 = vor.u32 %v2122_v51, %v1989_v54  ;;  %s2320_s9 = smov 32   ;;  %s2321_s15 = smov 48  }
  0xcf   : > { %974 = vmatpush.bf16.msra.mxu1 %v2008_v42  ;;  %s2838_s14 = scalar_lea.vmem %s2792_s8, %s2451_s21  ;;  %s2839_s16 = sld [smem:[#allocation14_spill]] }
  0xd0   : > { %846 = vadd.xlane.f32.xlu0 %v845_v13  ;;  %v850_v17 = vsub.f32 1.0, %v849_v16 }
  0xd2   : > { %v851_v18 = vmul.f32 %v2222_v15, %v850_v17  ;;  %961 = vmatpush.bf16.msra.mxu0 %v1996_v46  ;;  %v2215_v17 = vld [vmem:[%s2836_s18] ss:$0 sm:$0xff] }
  0xd3   : > { %975 = vmatpush.bf16.msra.mxu1 %v2000_v48 }
  0xd4   : > { %v852_v19 = vadd.f32 %v2222_v15, %v851_v18 }
  0xd5   : > { %s2840_s28 = scalar_lea.vmem %s2839_s16, %s2451_s21 }
  0xd6   : > { %v2535_v20 = vsel %vm853_vm2, %v2222_v15, %v852_v19  ;;  %962 = vmatpush.bf16.msra.mxu0 %v1988_v53 }
  0xd7   : > { %976 = vmatpush.bf16.msra.mxu1 %v1992_v56 }
 0x13b   : > { %v844_v21 = vpop.xlane.xlu0 %843 }
 0x13c   : > { %v855_v22 = vmul.f32 %v2535_v20, %v844_v21 }
 0x13e   : > { %v2539_v23 = vsub.f32 %v2527_v10, %v855_v22 }
 0x140   : > { %v859_v24 = vmul.f32 %v2539_v23, %v2539_v23 }
 0x142   : > { %v861_v25 = vsel %vm841_vm1, %v859_v24, 0.0 }
 0x143   : > { %862 = vadd.xlane.f32.xlu1 %v861_v25  ;;  %v847_v26 = vpop.xlane.xlu0 %846 }
 0x144   : > { %v856_v27 = vmul.f32 %v2535_v20, %v847_v26 }
 0x146   : > { %v2546_v28 = vsub.f32 %v2531_v12, %v856_v27 }
 0x148   : > { %v860_v29 = vmul.f32 %v2546_v28, %v2546_v28 }
 0x14a   : > { %v864_v30 = vsel %vm841_vm1, %v860_v29, 0.0 }
 0x14b   : > { %865 = vadd.xlane.f32.xlu1 %v864_v30 }
 0x1b6   : > { %v863_v52 = vpop.xlane.xlu1 %862 }
 0x1b7   : > { %v867_v55 = vmul.f32 %v863_v52, %v2535_v20 }
 0x1b9   : > { %v869_v57 = vadd.f32 1e-05, %v867_v55 }
 0x1bb   : > { %2223 = vrsqrt.f32 %v869_v57  ;;  %vm877_vm4 = vweird.f32 %v869_v57 }
 0x1be   : > { %v866_v58 = vpop.xlane.xlu1 %865 }
 0x1bf   : > { %v868_v59 = vmul.f32 %v866_v58, %v2535_v20 }
 0x1c1   : > { %v2224_v60 = vpop.eup %2223  ;;  %v870_v61 = vadd.f32 1e-05, %v868_v59 }
 0x1c2   : > { %v872_v62 = vmul.f32 %v2224_v60, %v869_v57  ;;  %vm878_vm3 = vweird.f32 %v2224_v60 }
 0x1c3   : > { %2225 = vrsqrt.f32 %v870_v61  ;;  %vm879_vm5 = vmor %vm877_vm4, %vm878_vm3  ;;  %vm887_vm7 = vweird.f32 %v870_v61 }
 0x1c4   : > { %v873_v63 = vmul.f32 %v2224_v60, %v872_v62 }
 0x1c6   : > { %v874_v0 = vmul.f32 0.5, %v873_v63 }
 0x1c8   : > { %v875_v1 = vsub.f32 1.5, %v874_v0 }
 0x1c9   : > { %v2226_v2 = vpop.eup %2225 }
 0x1ca   : > { %v876_v3 = vmul.f32 %v2224_v60, %v875_v1  ;;  %v882_v4 = vmul.f32 %v2226_v2, %v870_v61  ;;  %vm888_vm6 = vweird.f32 %v2226_v2 }
 0x1cb   : > { %vm889_vm8 = vmor %vm887_vm7, %vm888_vm6 }
 0x1cc   : > { %v883_v5 = vmul.f32 %v2226_v2, %v882_v4  ;;  %v880_v6 = vsel %vm879_vm5, %v2224_v60, %v876_v3 }
 0x1cd   : > { %v891_v9 = vmul.f32 %v880_v6, %v2539_v23 }
 0x1ce   : > { %v884_v7 = vmul.f32 0.5, %v883_v5 }
 0x1cf   : > { %v896_v16 = vmul.f32 %v2214_v11, %v891_v9 }
 0x1d0   : > { %v885_v8 = vsub.f32 1.5, %v884_v7 }
 0x1d1   : > { %v901_v19 = vadd.f32 %v2215_v17, %v896_v16 }
 0x1d2   : > { %v886_v13 = vmul.f32 %v2226_v2, %v885_v8 }
 0x1d4   : > { %v890_v14 = vsel %vm889_vm8, %v2226_v2, %v886_v13 }
 0x1d5   : > { %v892_v15 = vmul.f32 %v890_v14, %v2546_v28 }
 0x1d7   : > { %v897_v18 = vmul.f32 %v2214_v11, %v892_v15 }
 0x1d9   : > { %v902_v21 = vadd.f32 %v2215_v17, %v897_v18 }
 0x1db   : > { %v903_v22 = vpack.c.bf16 %v902_v21, %v901_v19 }
 0x1dd   : > { %2017 = vmatmul.msk.bf16.vlgmr.msra.gmra.mxu0 %vm841_vm1, %v903_v22  ;;  %2018 = vmatmul.msk.bf16.vlgmr.msra.gmra.mxu1 %vm841_vm1, %v903_v22 }
 0x25a   : > { %v964_v23 = vpop.f32.mrf.mxu0  ;;  %v978_v24 = vpop.f32.mrf.mxu1 }
 0x25b   : > { %v987_v25 = vpack.c.bf16 %v964_v23, %v964_v23  ;;  %v2585_v26 = vpack.c.bf16 %v978_v24, %v978_v24  ;;  %v983_v36 = vmul.f32 0.25, %v964_v23 }
 0x25d   : > { %1011 = vrot.lane.b32.xlu0 %v987_v25, %s2315_s27  ;;  %1007 = vrot.lane.b32.xlu2 %v987_v25, %s2316_s1  ;;  %v1247_v31 = vunpack.c.l.b16 %v2585_v26  ;;  %v985_v37 = vpack.c.bf16 %v983_v36, %v983_v36  ;;  %v1036_v39 = vunpack.c.l.b16 %v987_v25 }
 0x25f   : > { %v1033_v59 = vunpack.c.l.b16 %v985_v37 }
 0x262   : > { %v966_v27 = vpop.f32.mrf.mxu0  ;;  %v980_v28 = vpop.f32.mrf.mxu1 }
 0x263   : > { %v988_v29 = vpack.c.bf16 %v966_v27, %v966_v27  ;;  %v2587_v30 = vpack.c.bf16 %v980_v28, %v980_v28  ;;  %v984_v33 = vmul.f32 0.25, %v966_v27 }
 0x265   : > { %1013 = vrot.lane.b32.xlu1 %v988_v29, %s2315_s27  ;;  %1009 = vrot.lane.b32.xlu2 %v988_v29, %s2316_s1  ;;  %v1248_v32 = vunpack.c.l.b16 %v2587_v30  ;;  %v986_v35 = vpack.c.bf16 %v984_v33, %v984_v33  ;;  %v1037_v38 = vunpack.c.l.b16 %v988_v29 }
 0x267   : > { %v1249_v34 = vpack.c.b16 %v1248_v32, %v1247_v31  ;;  %v1038_v40 = vpack.c.b16 %v1037_v38, %v1036_v39  ;;  %v1034_v58 = vunpack.c.l.b16 %v986_v35 }
 0x269   : > { %1261 = vmatpush.bf16.msrb.mxu0 %v1249_v34  ;;  %v1035_v60 = vpack.c.b16 %v1034_v58, %v1033_v59 }
 0x26d   : > { %1015 = vrot.lane.b32.xlu2 %v987_v25, %s2317_s23  ;;  %995 = vrot.lane.b32.xlu1 %v986_v35, %s2316_s1 }
 0x275   : > { %1017 = vrot.lane.b32.xlu2 %v988_v29, %s2317_s23  ;;  %997 = vrot.lane.b32.xlu1 %v985_v37, %s2315_s27 }
 0x27d   : > { %1039 = vrot.lane.b32.xlu2 %v1038_v40, %s2318_s2  ;;  %1003 = vrot.lane.b32.xlu1 %v986_v35, %s2317_s23 }
 0x285   : > { %993 = vrot.lane.b32.xlu2 %v985_v37, %s2316_s1 }
 0x2b7   : > { %v1008_v41 = vpop.permute.xlu2 %1007 }
 0x2b8   : > { %v1065_v43 = vunpack.c.l.b16 %v1008_v41 }
 0x2bf   : > { %v1010_v42 = vpop.permute.xlu2 %1009 }
 0x2c0   : > { %v1066_v44 = vunpack.c.l.b16 %v1010_v42 }
 0x2c2   : > { %v1067_v45 = vpack.c.b16 %v1066_v44, %v1065_v43 }
 0x2c4   : > { %1068 = vrot.lane.b32.xlu0 %v1067_v45, %s2318_s2 }
 0x2c7   : > { %v1016_v46 = vpop.permute.xlu2 %1015 }
 0x2c8   : > { %v1121_v48 = vunpack.c.l.b16 %v1016_v46 }
 0x2cf   : > { %v1018_v47 = vpop.permute.xlu2 %1017  ;;  %v1012_v51 = vpop.permute.xlu0 %1011 }
 0x2d0   : > { %v1122_v49 = vunpack.c.l.b16 %v1018_v47  ;;  %v1093_v54 = vunpack.c.l.b16 %v1012_v51 }
 0x2d2   : > { %v1123_v50 = vpack.c.b16 %v1122_v49, %v1121_v48 }
 0x2d4   : > { %1124 = vrot.lane.b32.xlu2 %v1123_v50, %s2318_s2 }
 0x2d7   : > { %v1014_v52 = vpop.permute.xlu1 %1013  ;;  %v1040_v53 = vpop.permute.xlu2 %1039 }
 0x2d8   : > { %v1094_v55 = vunpack.c.l.b16 %v1014_v52  ;;  %v1046_v56 = vsel %vm1041_vm9, %v1040_v53, 0 }
 0x2d9   : > { %1055 = vmatpush.bf16.xpose.msra.mxu3 %v1046_v56 }
 0x2da   : > { %v1095_v57 = vpack.c.b16 %v1094_v55, %v1093_v54 }
 0x2dc   : > { %1096 = vrot.lane.b32.xlu0 %v1095_v57, %s2318_s2  ;;  %1001 = vrot.lane.b32.xlu2 %v985_v37, %s2317_s23  ;;  %s2842_s2 = sld [smem:[#allocation3_spill]] }
 0x2df   : > { %v994_v61 = vpop.permute.xlu2 %993  ;;  %v996_v62 = vpop.permute.xlu1 %995 }
 0x2e0   : > { %2019 = vmatmul.msk.bf16.vlgmr.msra.gmra.mxu3 %vm1041_vm9, %v1035_v60  ;;  %v1062_v3 = vunpack.c.l.b16 %v994_v61  ;;  %v1063_v4 = vunpack.c.l.b16 %v996_v62 }
 0x2e2   : > { %v1064_v5 = vpack.c.b16 %v1063_v4, %v1062_v3  ;;  %p2093_p8 = scmp.ne.s32.totalorder %s2842_s2, 1 }
 0x2e3   : > { %s2844_s0 = sld [smem:[#allocation15_spill]] (!%p2093_p8) }
 0x2e4   : > { %999 = vrot.lane.b32.xlu0 %v986_v35, %s2315_s27 }
 0x2e7   : > { %v998_v6 = vpop.permute.xlu1 %997 }
 0x2e8   : > { %v1090_v17 = vunpack.c.l.b16 %v998_v6 }
 0x2ef   : > { %v1004_v8 = vpop.permute.xlu1 %1003 }
 0x2f0   : > { %v1119_v11 = vunpack.c.l.b16 %v1004_v8 }
 0x32e   : > { %v1125_v63 = vpop.permute.xlu2 %1124 }
 0x32f   : > { %v1130_v2 = vsel %vm1041_vm9, %v1125_v63, 0 }
 0x336   : > { %v1069_v0 = vpop.permute.xlu0 %1068  ;;  %v1002_v7 = vpop.permute.xlu2 %1001 }
 0x337   : > { %v1074_v1 = vsel %vm1041_vm9, %v1069_v0, 0  ;;  %v1118_v9 = vunpack.c.l.b16 %v1002_v7 }
 0x338   : > { %1083 = vmatpush.bf16.xpose.msrb.mxu3 %v1074_v1 }
 0x339   : > { %v1120_v13 = vpack.c.b16 %v1119_v11, %v1118_v9 }
 0x33f   : > { %2020 = vmatmul.msk.bf16.vlgmr.msrb.gmra.mxu3 %vm1041_vm9, %v1064_v5 }
 0x340   : > { %1139 = vmatpush.bf16.xpose.msra.mxu3 %v1130_v2 }
 0x34e   : > { %v1097_v14 = vpop.permute.xlu0 %1096 }
 0x34f   : > { %2022 = vmatmul.msk.bf16.vlgmr.msra.gmra.mxu3 %vm1041_vm9, %v1120_v13  ;;  %v1102_v15 = vsel %vm1041_vm9, %v1097_v14, 0 }
 0x350   : > { %1111 = vmatpush.bf16.xpose.msra.mxu2 %v1102_v15 }
 0x356   : > { %v1000_v16 = vpop.permute.xlu0 %999 }
 0x357   : > { %v1091_v18 = vunpack.c.l.b16 %v1000_v16 }
 0x359   : > { %v1092_v19 = vpack.c.b16 %v1091_v18, %v1090_v17 }
 0x35b   : > { %2021 = vmatmul.msk.bf16.vlgmr.msra.gmra.mxu2 %vm1041_vm9, %v1092_v19 }
 0x363   : > { %v2609_v21 = vpop.f32.mrf.mxu3 }
 0x364   : > { %v1146_v22 = vsel %vm1041_vm9, %v2609_v21, -inf }
 0x365   : > { %1147 = vmax.xlane.f32.xlu0 %v1146_v22 }
 0x36b   : > { %v2613_v23 = vpop.f32.mrf.mxu3 }
 0x36c   : > { %v1149_v24 = vsel %vm1041_vm9, %v2613_v23, -inf }
 0x36d   : > { %1150 = vmax.xlane.f32.xlu2 %v1149_v24 }
 0x3c2   : > { %v1085_v25 = vpop.f32.mrf.mxu3 }
 0x3c3   : > { %v1152_v27 = vsel %vm1041_vm9, %v1085_v25, -inf }
 0x3c4   : > { %1153 = vmax.xlane.f32.xlu2 %v1152_v27 }
 0x3ca   : > { %v1087_v28 = vpop.f32.mrf.mxu3 }
 0x3cb   : > { %v1155_v29 = vsel %vm1041_vm9, %v1087_v28, -inf }
 0x3cc   : > { %1156 = vmax.xlane.f32.xlu1 %v1155_v29 }
 0x3d2   : > { %v1141_v31 = vpop.f32.mrf.mxu3 }
 0x3d3   : > { %v1164_v32 = vsel %vm1041_vm9, %v1141_v31, -inf }
 0x3d4   : > { %1165 = vmax.xlane.f32.xlu1 %v1164_v32 }
 0x3d8   : > { %v1148_v52 = vpop.xlane.xlu0 %1147 }
 0x3d9   : > { %v1170_v14 = vsub.f32 %v2609_v21, %v1148_v52 }
 0x3da   : > { %v1143_v35 = vpop.f32.mrf.mxu3 }
 0x3db   : > { %v1167_v38 = vsel %vm1041_vm9, %v1143_v35, -inf  ;;  %v1178_v15 = vmul.f32 1.442695, %v1170_v14 }
 0x3de   : > { %v1113_v33 = vpop.f32.mrf.mxu2 }
 0x3df   : > { %v1158_v34 = vsel %vm1041_vm9, %v1113_v33, -inf }
 0x3e0   : > { %1159 = vmax.xlane.f32.xlu0 %v1158_v34  ;;  %v1151_v39 = vpop.xlane.xlu2 %1150 }
 0x3e1   : > { %v1171_v16 = vsub.f32 %v2613_v23, %v1151_v39 }
 0x3e3   : > { %v1180_v17 = vmul.f32 1.442695, %v1171_v16 }
 0x3e6   : > { %v1115_v36 = vpop.f32.mrf.mxu2 }
 0x3e7   : > { %v1161_v37 = vsel %vm1041_vm9, %v1115_v36, -inf }
 0x3e8   : > { %1162 = vmax.xlane.f32.xlu2 %v1161_v37  ;;  %1168 = vmax.xlane.f32.xlu0 %v1167_v38 }
 0x3ed   : > { %1025 = vrot.lane.b32.xlu1 %v2585_v26, %s2315_s27 }
 0x3fc   : > { %1027 = vrot.lane.b32.xlu0 %v2587_v30, %s2315_s27 }
 0x400   : > { %1029 = vrot.lane.b32.xlu2 %v2585_v26, %s2317_s23 }
 0x437   : > { %v1154_v40 = vpop.xlane.xlu2 %1153 }
 0x438   : > { %v1172_v41 = vsub.f32 %v1085_v25, %v1154_v40 }
 0x43a   : > { %v1182_v42 = vmul.f32 1.442695, %v1172_v41 }
 0x43c   : > { %2227 = vpow2.f32 %v1182_v42 }
 0x43f   : > { %v1157_v43 = vpop.xlane.xlu1 %1156 }
 0x440   : > { %v1173_v44 = vsub.f32 %v1087_v28, %v1157_v43 }
 0x442   : > { %v2629_v45 = vpop.eup %2227  ;;  %v1184_v46 = vmul.f32 1.442695, %v1173_v44 }
 0x443   : > { %v1200_v47 = vsel %vm1041_vm9, %v2629_v45, 0.0 }
 0x444   : > { %2229 = vpow2.f32 %v1184_v46  ;;  %1201 = vadd.xlane.f32.xlu0 %v1200_v47 }
 0x447   : > { %v1166_v48 = vpop.xlane.xlu1 %1165 }
 0x448   : > { %v1176_v49 = vsub.f32 %v1141_v31, %v1166_v48 }
 0x44a   : > { %v2633_v50 = vpop.eup %2229  ;;  %v1190_v51 = vmul.f32 1.442695, %v1176_v49 }
 0x44b   : > { %v1203_v53 = vsel %vm1041_vm9, %v2633_v50, 0.0 }
 0x44c   : > { %2231 = vpow2.f32 %v1190_v51  ;;  %1204 = vadd.xlane.f32.xlu2 %v1203_v53 }
 0x452   : > { %v2637_v54 = vpop.eup %2231 }
 0x453   : > { %v1160_v55 = vpop.xlane.xlu0 %1159  ;;  %v1212_v56 = vsel %vm1041_vm9, %v2637_v54, 0.0 }
 0x454   : > { %v1174_v57 = vsub.f32 %v1113_v33, %v1160_v55  ;;  %1213 = vadd.xlane.f32.xlu2 %v1212_v56 }
 0x456   : > { %v1186_v58 = vmul.f32 1.442695, %v1174_v57 }
 0x458   : > { %2233 = vpow2.f32 %v1186_v58 }
 0x45b   : > { %v1163_v59 = vpop.xlane.xlu2 %1162  ;;  %v1169_v60 = vpop.xlane.xlu0 %1168 }
 0x45c   : > { %v1175_v61 = vsub.f32 %v1115_v36, %v1163_v59  ;;  %v1177_v62 = vsub.f32 %v1143_v35, %v1169_v60 }
 0x45e   : > { %v2234_v63 = vpop.eup %2233  ;;  %v1188_v0 = vmul.f32 1.442695, %v1175_v61  ;;  %v1192_v1 = vmul.f32 1.442695, %v1177_v62 }
 0x45f   : > { %v1206_v2 = vsel %vm1041_vm9, %v2234_v63, 0.0  ;;  %v1026_v7 = vpop.permute.xlu1 %1025 }
 0x460   : > { %2235 = vpow2.f32 %v1188_v0  ;;  %1207 = vadd.xlane.f32.xlu1 %v1206_v2  ;;  %v1299_v9 = vunpack.c.l.b16 %v1026_v7 }
 0x461   : > { %2237 = vpow2.f32 %v1192_v1 }
 0x462   : > { %2239 = vpow2.f32 %v1178_v15 }
 0x463   : > { %2241 = vpow2.f32 %v1180_v17 }
 0x466   : > { %v2236_v3 = vpop.eup %2235 }
 0x467   : > { %v2238_v4 = vpop.eup %2237  ;;  %v1209_v5 = vsel %vm1041_vm9, %v2236_v3, 0.0 }
 0x468   : > { %1210 = vadd.xlane.f32.xlu0 %v1209_v5  ;;  %v1215_v6 = vsel %vm1041_vm9, %v2238_v4, 0.0  ;;  %v2652_v18 = vpop.eup %2239 }
 0x469   : > { %1216 = vadd.xlane.f32.xlu1 %v1215_v6  ;;  %v1194_v19 = vsel %vm1041_vm9, %v2652_v18, 0.0  ;;  %v2656_v22 = vpop.eup %2241 }
 0x46c   : > { %1023 = vrot.lane.b32.xlu2 %v2587_v30, %s2316_s1 }
 0x46e   : > { %v1028_v8 = vpop.permute.xlu0 %1027 }
 0x46f   : > { %v1300_v11 = vunpack.c.l.b16 %v1028_v8 }
 0x471   : > { %v1301_v13 = vpack.c.b16 %v1300_v11, %v1299_v9 }
 0x473   : > { %1313 = vmatpush.bf16.msrb.mxu2 %v1301_v13 }
 0x47c   : > { %1031 = vrot.lane.b32.xlu0 %v2587_v30, %s2317_s23  ;;  %v1197_v30 = vsel %vm1041_vm9, %v2656_v22, 0.0 }
 0x482   : > { %1021 = vrot.lane.b32.xlu1 %v2585_v26, %s2316_s1  ;;  %v1030_v26 = vpop.permute.xlu2 %1029  ;;  %s2841_s1 = scalar_lea.vmem %s2795_s11, %s2451_s21 }
 0x483   : > { %v1325_v51 = vunpack.c.l.b16 %v1030_v26 }
 0x4a6   : > { %1195 = vadd.xlane.f32.xlu0 %v1194_v19 }
 0x4ac   : > { %1198 = vadd.xlane.f32.xlu1 %v1197_v30 }
 0x4b7   : > { %v1202_v21 = vpop.xlane.xlu0 %1201 }
 0x4bf   : > { %v1205_v25 = vpop.xlane.xlu2 %1204 }
 0x4c7   : > { %v1214_v29 = vpop.xlane.xlu2 %1213 }
 0x4cf   : > { %v1024_v59 = vpop.permute.xlu2 %1023 }
 0x4d0   : > { %v1274_v62 = vunpack.c.l.b16 %v1024_v59 }
 0x4d3   : > { %v1208_v24 = vpop.xlane.xlu1 %1207 }
 0x4d4   : > { %2243 = vrcp.f32 %v1208_v24  ;;  %v2133_v24 = vld [vmem:[%s2478_s24 + $0x18] sm:$0xff] }
 0x4d5   : > { %1418 = vmatpush.bf16.msra.mxu0 %v2133_v24  ;;  %v2217_v24 = vld [vmem:[%s2838_s14] ss:$0 sm:$0xff] }
 0x4da   : > { %v2244_v27 = vpop.eup %2243 }
 0x4db   : > { %v1211_v23 = vpop.xlane.xlu0 %1210  ;;  %v1230_v31 = vmul.f32 %v2244_v27, %v2234_v63  ;;  %v2130_v27 = vld [vmem:[%s2478_s24] sm:$0xff] }
 0x4dc   : > { %v1217_v28 = vpop.xlane.xlu1 %1216  ;;  %2245 = vrcp.f32 %v1211_v23  ;;  %v2131_v23 = vld [vmem:[%s2478_s24 + $0x8] sm:$0xff] }
 0x4dd   : > { %2247 = vrcp.f32 %v1217_v28  ;;  %v1238_v33 = vpack.c.bf16 %v1230_v31, %v1230_v31 }
 0x4de   : > { %2249 = vrcp.f32 %v1214_v29 }
 0x4df   : > { %2251 = vrcp.f32 %v1205_v25  ;;  %v1296_v38 = vunpack.c.l.b16 %v1238_v33  ;;  %v2132_v25 = vld [vmem:[%s2478_s24 + $0x10] sm:$0xff] }
 0x4e0   : > { %2253 = vrcp.f32 %v1202_v21  ;;  %1419 = vmatpush.bf16.msra.mxu0 %v2132_v25 }
 0x4e2   : > { %v2246_v32 = vpop.eup %2245 }
 0x4e3   : > { %v1231_v34 = vmul.f32 %v2246_v32, %v2236_v3  ;;  %v2248_v35 = vpop.eup %2247 }
 0x4e4   : > { %v2250_v37 = vpop.eup %2249  ;;  %v1233_v40 = vmul.f32 %v2248_v35, %v2238_v4  ;;  %1420 = vmatpush.bf16.msra.mxu0 %v2131_v23 }
 0x4e5   : > { %v1239_v36 = vpack.c.bf16 %v1231_v34, %v1231_v34  ;;  %v1232_v42 = vmul.f32 %v2250_v37, %v2637_v54  ;;  %v2252_v43 = vpop.eup %2251 }
 0x4e6   : > { %v1241_v44 = vpack.c.bf16 %v1233_v40, %v1233_v40  ;;  %v2254_v46 = vpop.eup %2253  ;;  %v1229_v47 = vmul.f32 %v2252_v43, %v2633_v50 }
 0x4e7   : > { %v1297_v39 = vunpack.c.l.b16 %v1239_v36  ;;  %v1240_v48 = vpack.c.bf16 %v1232_v42, %v1232_v42  ;;  %v1228_v53 = vmul.f32 %v2254_v46, %v2629_v45 }
 0x4e8   : > { %v1323_v55 = vunpack.c.l.b16 %v1241_v44  ;;  %v1237_v57 = vpack.c.bf16 %v1229_v47, %v1229_v47  ;;  %1421 = vmatpush.bf16.msra.mxu0 %v2130_v27 }
 0x4e9   : > { %v1298_v41 = vpack.c.b16 %v1297_v39, %v1296_v38  ;;  %v1322_v58 = vunpack.c.l.b16 %v1240_v48  ;;  %v1236_v54 = vpack.c.bf16 %v1228_v53, %v1228_v53  ;;  %v2216_v48 = vld [vmem:[%s2837_s25] ss:$0 sm:$0xff] }
 0x4ea   : > { %v1271_v0 = vunpack.c.l.b16 %v1237_v57 }
 0x4eb   : > { %2025 = vmatmul.msk.bf16.vlgmr.msrb.gmra.mxu2 %vm1041_vm9, %v1298_v41  ;;  %v1324_v60 = vpack.c.b16 %v1323_v55, %v1322_v58  ;;  %v1270_v1 = vunpack.c.l.b16 %v1236_v54 }
 0x4ed   : > { %v1272_v2 = vpack.c.b16 %v1271_v0, %v1270_v1  ;;  %v2137_v1 = vld [vmem:[%s2491_s5 + $0x18] sm:$0xff] }
 0x4ee   : > { %v1032_v49 = vpop.permute.xlu0 %1031 }
 0x4ef   : > { %v1326_v52 = vunpack.c.l.b16 %v1032_v49 }
 0x4f1   : > { %v1327_v56 = vpack.c.b16 %v1326_v52, %v1325_v51 }
 0x4f3   : > { %1339 = vmatpush.bf16.msrb.mxu3 %v1327_v56 }
 0x4f4   : > { %v1022_v61 = vpop.permute.xlu1 %1021 }
 0x4f5   : > { %v1273_v63 = vunpack.c.l.b16 %v1022_v61 }
 0x4f6   : > { %2026 = vmatmul.msk.bf16.vlgmr.msrb.gmra.mxu3 %vm1041_vm9, %v1324_v60 }
 0x4f7   : > { %v1275_v50 = vpack.c.b16 %v1274_v62, %v1273_v63 }
 0x4f9   : > { %1287 = vmatpush.bf16.msrb.mxu1 %v1275_v50 }
 0x4fc   : > { %2024 = vmatmul.msk.bf16.vlgmr.msrb.gmra.mxu1 %vm1041_vm9, %v1272_v2  ;;  %v2136_v2 = vld [vmem:[%s2491_s5 + $0x10] sm:$0xff] }
 0x4fd   : > { %1536 = vmatpush.bf16.msra.mxu1 %v2137_v1 }
 0x501   : > { %1537 = vmatpush.bf16.msra.mxu1 %v2136_v2 }
 0x519   : > { %v1196_v45 = vpop.xlane.xlu0 %1195 }
 0x51a   : > { %2255 = vrcp.f32 %v1196_v45  ;;  %v2135_v45 = vld [vmem:[%s2491_s5 + $0x8] sm:$0xff] }
 0x51b   : > { %1538 = vmatpush.bf16.msra.mxu1 %v2135_v45 }
 0x51f   : > { %v1199_v3 = vpop.xlane.xlu1 %1198 }
 0x520   : > { %v2256_v4 = vpop.eup %2255  ;;  %2257 = vrcp.f32 %v1199_v3 }
 0x521   : > { %v1226_v5 = vmul.f32 %v2256_v4, %v2652_v18 }
 0x523   : > { %v1234_v7 = vpack.c.bf16 %v1226_v5, %v1226_v5  ;;  %v2134_v5 = vld [vmem:[%s2491_s5] sm:$0xff] }
 0x524   : > { %1539 = vmatpush.bf16.msra.mxu1 %v2134_v5 }
 0x525   : > { %v1244_v11 = vunpack.c.l.b16 %v1234_v7 }
 0x526   : > { %v2258_v6 = vpop.eup %2257 }
 0x527   : > { %v1227_v8 = vmul.f32 %v2258_v6, %v2656_v22 }
 0x529   : > { %v1235_v9 = vpack.c.bf16 %v1227_v8, %v1227_v8 }
 0x52b   : > { %v1245_v13 = vunpack.c.l.b16 %v1235_v9 }
 0x52d   : > { %v1246_v14 = vpack.c.b16 %v1245_v13, %v1244_v11 }
 0x52f   : > { %2023 = vmatmul.msk.bf16.vlgmr.msrb.gmra.mxu0 %vm1041_vm9, %v1246_v14 }
 0x56e   : > { %v1315_v16 = vpop.f32.mrf.mxu2 }
 0x576   : > { %v1317_v30 = vpop.f32.mrf.mxu2 }
 0x577   : > { %v2204_v26 = vpack.i.bf16 %v1317_v30, %v1315_v16 }
 0x579   : > { %v1289_v15 = vpop.f32.mrf.mxu1  ;;  %v1341_v18 = vpop.f32.mrf.mxu3 }
 0x581   : > { %v1291_v17 = vpop.f32.mrf.mxu1  ;;  %v1343_v22 = vpop.f32.mrf.mxu3 }
 0x582   : > { %v2199_v19 = vpack.i.bf16 %v1291_v17, %v1289_v15  ;;  %v2209_v21 = vpack.i.bf16 %v1343_v22, %v1341_v18 }
 0x584   : > { %2200 = vrot.lane.b32.xlu2 %v2199_v19, %s2319_s20  ;;  %s2843_s20 = sld [smem:[#allocation17_spill]] (!%p2093_p8) }
 0x58c   : > { %2205 = vrot.lane.b32.xlu2 %v2204_v26, %s2320_s9 }
 0x594   : > { %2210 = vrot.lane.b32.xlu2 %v2209_v21, %s2321_s15 }
 0x5ac   : > { %v1263_v29 = vpop.f32.mrf.mxu0 }
 0x5b4   : > { %v1265_v36 = vpop.f32.mrf.mxu0 }
 0x5de   : > { %v2201_v28 = vpop.permute.xlu2 %2200 }
 0x5df   : > { %v2203_v32 = vunpack.i.h.bf16 %v2201_v28  ;;  %v2202_v33 = vunpack.i.l.bf16 %v2201_v28  ;;  %v2218_v28 = vld [vmem:[%s2840_s28] ss:$0 sm:$0xff]  ;;  %s2845_s28 = sld [smem:[#allocation16_spill]] (!%p2093_p8) }
 0x5e1   : > { %v1370_v38 = vsel %vm1041_vm9, %v1263_v29, %v2202_v33  ;;  %v1371_v39 = vsel %vm1041_vm9, %v1265_v36, %v2203_v32  ;;  %v2145_v36 = vld [vmem:[%s2500_s6 + $0x38] sm:$0xff] }
 0x5e2   : > { %1633 = vmatpush.bf16.msra.mxu2 %v2145_v36 }
 0x5e6   : > { %v2206_v31 = vpop.permute.xlu2 %2205 }
 0x5e7   : > { %v2208_v34 = vunpack.i.h.bf16 %v2206_v31  ;;  %v2207_v35 = vunpack.i.l.bf16 %v2206_v31 }
 0x5e9   : > { %v1373_v42 = vsel %vm1372_vm10, %v1370_v38, %v2207_v35  ;;  %v1374_v43 = vsel %vm1372_vm10, %v1371_v39, %v2208_v34  ;;  %v2143_v38 = vld [vmem:[%s2500_s6 + $0x28] sm:$0xff]  ;;  %v2142_v39 = vld [vmem:[%s2500_s6 + $0x20] sm:$0xff] }
 0x5ee   : > { %v2211_v37 = vpop.permute.xlu2 %2210 }
 0x5ef   : > { %v2213_v40 = vunpack.i.h.bf16 %v2211_v37  ;;  %v2212_v41 = vunpack.i.l.bf16 %v2211_v37  ;;  %v2144_v37 = vld [vmem:[%s2500_s6 + $0x30] sm:$0xff] }
 0x5f0   : > { %1634 = vmatpush.bf16.msra.mxu2 %v2144_v37 }
 0x5f1   : > { %v1376_v44 = vsel %vm1375_vm11, %v1373_v42, %v2212_v41  ;;  %v1377_v46 = vsel %vm1375_vm11, %v1374_v43, %v2213_v40  ;;  %v2141_v40 = vld [vmem:[%s2500_s6 + $0x18] sm:$0xff]  ;;  %v2140_v41 = vld [vmem:[%s2500_s6 + $0x10] sm:$0xff]  ;;  %v2139_v42 = vld [vmem:[%s2500_s6 + $0x8] sm:$0xff] }
 0x5f2   : > { %v1378_v47 = vpack.c.bf16 %v1377_v46, %v1376_v44  ;;  %v2138_v43 = vld [vmem:[%s2500_s6] sm:$0xff] }
 0x5f3   : > { %v2219_v44 = vld [vmem:[%s2841_s1] ss:$0 sm:$0xff]  ;;  %s2846_s1 = sld [smem:[#allocation18_spill]] (!%p2093_p8) }
 0x5f4   : > { %2043 = vmatmul.msk.bf16.vlgmr.msra.gmra.mxu0 %vm841_vm1, %v1378_v47  ;;  %1635 = vmatpush.bf16.msra.mxu2 %v2143_v38 }
 0x5f8   : > { %1636 = vmatpush.bf16.msra.mxu2 %v2142_v39 }
 0x5fc   : > { %1637 = vmatpush.bf16.msra.mxu2 %v2141_v40 }
 0x600   : > { %1638 = vmatpush.bf16.msra.mxu2 %v2140_v41 }
 0x604   : > { %1639 = vmatpush.bf16.msra.mxu2 %v2139_v42 }
 0x608   : > { %1640 = vmatpush.bf16.msra.mxu2 %v2138_v43 }
 0x671   : > { %v1423_v49 = vpop.f32.mrf.mxu0 }
 0x672   : > { %v1428_v51 = vadd.f32 %v1423_v49, %v2527_v10 }
 0x674   : > { %v2682_v52 = vadd.f32 %v2216_v48, %v1428_v51 }
 0x676   : > { %v1438_v53 = vsel %vm841_vm1, %v2682_v52, 0.0 }
 0x677   : > { %1439 = vadd.xlane.f32.xlu2 %v1438_v53 }
 0x679   : > { %v1425_v55 = vpop.f32.mrf.mxu0 }
 0x67a   : > { %v1429_v56 = vadd.f32 %v1425_v55, %v2531_v12 }
 0x67c   : > { %v2687_v57 = vadd.f32 %v2216_v48, %v1429_v56 }
 0x67e   : > { %v1441_v58 = vsel %vm841_vm1, %v2687_v57, 0.0 }
 0x67f   : > { %1442 = vadd.xlane.f32.xlu0 %v1441_v58 }
 0x6ea   : > { %v1440_v59 = vpop.xlane.xlu2 %1439 }
 0x6eb   : > { %v1444_v10 = vmul.f32 %v1440_v59, %v2535_v20 }
 0x6ed   : > { %v1446_v54 = vsub.f32 %v2682_v52, %v1444_v10 }
 0x6ef   : > { %v1448_v60 = vmul.f32 %v1446_v54, %v1446_v54 }
 0x6f1   : > { %v1450_v61 = vsel %vm841_vm1, %v1448_v60, 0.0 }
 0x6f2   : > { %1451 = vadd.xlane.f32.xlu1 %v1450_v61  ;;  %v1443_v12 = vpop.xlane.xlu0 %1442 }
 0x6f3   : > { %v1445_v62 = vmul.f32 %v1443_v12, %v2535_v20 }
 0x6f5   : > { %v1447_v63 = vsub.f32 %v2687_v57, %v1445_v62 }
 0x6f7   : > { %v1449_v0 = vmul.f32 %v1447_v63, %v1447_v63 }
 0x6f9   : > { %v1453_v50 = vsel %vm841_vm1, %v1449_v0, 0.0 }
 0x6fa   : > { %1454 = vadd.xlane.f32.xlu0 %v1453_v50 }
 0x765   : > { %v1452_v3 = vpop.xlane.xlu1 %1451 }
 0x766   : > { %v1456_v4 = vmul.f32 %v1452_v3, %v2535_v20 }
 0x768   : > { %v1458_v6 = vadd.f32 1e-05, %v1456_v4  ;;  %v2220_v4 = vld [vmem:[%s762_s30] ss:$0 sm:$0xff] }
 0x76a   : > { %2259 = vrsqrt.f32 %v1458_v6  ;;  %vm1466_vm13 = vweird.f32 %v1458_v6 }
 0x76d   : > { %v1455_v7 = vpop.xlane.xlu0 %1454 }
 0x76e   : > { %v1457_v8 = vmul.f32 %v1455_v7, %v2535_v20 }
 0x770   : > { %v2260_v9 = vpop.eup %2259  ;;  %v1459_v11 = vadd.f32 1e-05, %v1457_v8 }
 0x771   : > { %v1461_v13 = vmul.f32 %v2260_v9, %v1458_v6  ;;  %vm1467_vm12 = vweird.f32 %v2260_v9 }
 0x772   : > { %2261 = vrsqrt.f32 %v1459_v11  ;;  %vm1468_vm14 = vmor %vm1466_vm13, %vm1467_vm12  ;;  %vm1476_vm0 = vweird.f32 %v1459_v11 }
 0x773   : > { %v1462_v14 = vmul.f32 %v2260_v9, %v1461_v13 }
 0x775   : > { %v1463_v15 = vmul.f32 0.5, %v1462_v14 }
 0x777   : > { %v1464_v16 = vsub.f32 1.5, %v1463_v15 }
 0x778   : > { %v2262_v17 = vpop.eup %2261 }
 0x779   : > { %v1465_v19 = vmul.f32 %v2260_v9, %v1464_v16  ;;  %v1471_v18 = vmul.f32 %v2262_v17, %v1459_v11  ;;  %vm1477_vm15 = vweird.f32 %v2262_v17 }
 0x77a   : > { %vm1478_vm2 = vmor %vm1476_vm0, %vm1477_vm15 }
 0x77b   : > { %v1472_v30 = vmul.f32 %v2262_v17, %v1471_v18  ;;  %v1469_v26 = vsel %vm1468_vm14, %v2260_v9, %v1465_v19 }
 0x77c   : > { %v1480_v25 = vmul.f32 %v1469_v26, %v1446_v54 }
 0x77d   : > { %v1473_v22 = vmul.f32 0.5, %v1472_v30 }
 0x77e   : > { %v1485_v29 = vmul.f32 %v2217_v24, %v1480_v25 }
 0x77f   : > { %v1474_v21 = vsub.f32 1.5, %v1473_v22 }
 0x780   : > { %v1490_v33 = vadd.f32 %v2218_v28, %v1485_v29 }
 0x781   : > { %v1475_v23 = vmul.f32 %v2262_v17, %v1474_v21 }
 0x783   : > { %v1479_v27 = vsel %vm1478_vm2, %v2262_v17, %v1475_v23 }
 0x784   : > { %v1481_v31 = vmul.f32 %v1479_v27, %v1447_v63 }
 0x786   : > { %v1486_v32 = vmul.f32 %v2217_v24, %v1481_v31 }
 0x788   : > { %v1491_v34 = vadd.f32 %v2218_v28, %v1486_v32 }
 0x78a   : > { %v1492_v35 = vpack.c.bf16 %v1491_v34, %v1490_v33 }
 0x78c   : > { %2060 = vmatmul.msk.bf16.vlgmr.msra.gmra.mxu1 %vm841_vm1, %v1492_v35 }
 0x809   : > { %v1541_v46 = vpop.f32.mrf.mxu1 }
 0x80a   : > { %v1542_v47 = vadd.f32 %v2219_v44, %v1541_v46 }
 0x80c   : > { %v1548_v48 = vmul.f32 0.044715, %v1542_v47  ;;  %v1546_v0 = vmul.f32 0.5, %v1542_v47 }
 0x80e   : > { %v1550_v49 = vmul.f32 %v1548_v48, %v1542_v47 }
 0x810   : > { %v1552_v51 = vmul.f32 %v1550_v49, %v1542_v47 }
 0x811   : > { %v1543_v53 = vpop.f32.mrf.mxu1 }
 0x812   : > { %v1554_v55 = vadd.f32 %v1552_v51, %v1542_v47  ;;  %v1544_v56 = vadd.f32 %v2219_v44, %v1543_v53 }
 0x814   : > { %v1549_v58 = vmul.f32 0.044715, %v1544_v56  ;;  %v1556_v59 = vmul.f32 0.7978846, %v1554_v55  ;;  %v1547_v50 = vmul.f32 0.5, %v1544_v56 }
 0x816   : > { %v1551_v10 = vmul.f32 %v1549_v58, %v1544_v56  ;;  %2263 = vtanh.f32 %v1556_v59 }
 0x818   : > { %v1553_v54 = vmul.f32 %v1551_v10, %v1544_v56 }
 0x81a   : > { %v1555_v60 = vadd.f32 %v1553_v54, %v1544_v56 }
 0x81c   : > { %v1557_v61 = vmul.f32 0.7978846, %v1555_v60  ;;  %v2264_v12 = vpop.eup %2263 }
 0x81d   : > { %v1560_v62 = vadd.f32 1.0, %v2264_v12 }
 0x81e   : > { %2265 = vtanh.f32 %v1557_v61 }
 0x81f   : > { %v1562_v2 = vmul.f32 %v1560_v62, %v1546_v0 }
 0x824   : > { %v2266_v63 = vpop.eup %2265 }
 0x825   : > { %v1561_v1 = vadd.f32 1.0, %v2266_v63 }
 0x827   : > { %v1563_v45 = vmul.f32 %v1561_v1, %v1547_v50 }
 0x829   : > { %v1564_v3 = vpack.c.bf16 %v1563_v45, %v1562_v2 }
 0x82b   : > { %1641 = vmatmul.bf16.vlgmr.msra.gmra.mxu2 %v1564_v3 }
 0x8ae   : > { %v1642_v5 = vpop.f32.mrf.mxu2 }
 0x8af   : > { %v1643_v6 = vadd.f32 %v2220_v4, %v1642_v5 }
 0x8b1   : > { %v1647_v7 = vadd.f32 %v1643_v6, %v2682_v52 }
 0x8b3   : > { %1649 = vst.msk [vmem:[#allocation2] sm:$0xff] %vm841_vm1, %v1647_v7 }
 0x8b6   : > { %v1644_v8 = vpop.f32.mrf.mxu2 }
 0x8b7   : > { %v1645_v9 = vadd.f32 %v2220_v4, %v1644_v8  ;;  %1654 = sbr.rel (%p2093_p8) target bundleno = 2651 (0xa5b), region = 100 }
 0x8b9   : > { %v1648_v11 = vadd.f32 %v1645_v9, %v2687_v57 }
 0x8bb   : > { %1650 = vst.msk [vmem:[#allocation2 + $0x8] sm:$0xff] %vm841_vm1, %v1648_v11 }
 0x8bc   : > { %v1657_v13 = vsel %vm841_vm1, %v1647_v7, 0.0  ;;  %v1660_v14 = vsel %vm841_vm1, %v1648_v11, 0.0  ;;  %v2149_v21 = vld [vmem:[%s2843_s20 + $0x18] sm:$0xff]  ;;  %v2148_v24 = vld [vmem:[%s2843_s20 + $0x10] sm:$0xff]  ;;  %v2147_v25 = vld [vmem:[%s2843_s20 + $0x8] sm:$0xff] }
 0x8bd   : > { %1658 = vadd.xlane.f32.xlu0 %v1657_v13  ;;  %1755 = vmatpush.bf16.msra.mxu0 %v2149_v21  ;;  %v2146_v27 = vld [vmem:[%s2843_s20] sm:$0xff] }
 0x8be   : > { %v2268_v55 = vld [vmem:[%s2845_s28] ss:$0 sm:$0xff] }
 0x8bf   : > { %v2269_v54 = vld [vmem:[%s2846_s1] ss:$0 sm:$0xff] }
 0x8c1   : > { %1756 = vmatpush.bf16.msra.mxu0 %v2148_v24 }
 0x8c5   : > { %1661 = vadd.xlane.f32.xlu0 %v1660_v14  ;;  %1757 = vmatpush.bf16.msra.mxu0 %v2147_v25 }
 0x8c9   : > { %1758 = vmatpush.bf16.msra.mxu0 %v2146_v27 }
 0x930   : > { %v1659_v15 = vpop.xlane.xlu0 %1658 }
 0x931   : > { %v1663_v52 = vmul.f32 %v1659_v15, %v2535_v20 }
 0x933   : > { %v1665_v16 = vsub.f32 %v1647_v7, %v1663_v52 }
 0x935   : > { %v1667_v17 = vmul.f32 %v1665_v16, %v1665_v16 }
 0x937   : > { %v1669_v19 = vsel %vm841_vm1, %v1667_v17, 0.0 }
 0x938   : > { %1670 = vadd.xlane.f32.xlu1 %v1669_v19  ;;  %v1662_v57 = vpop.xlane.xlu0 %1661 }
 0x939   : > { %v1664_v18 = vmul.f32 %v1662_v57, %v2535_v20 }
 0x93b   : > { %v1666_v30 = vsub.f32 %v1648_v11, %v1664_v18 }
 0x93d   : > { %v1668_v26 = vmul.f32 %v1666_v30, %v1666_v30 }
 0x93f   : > { %v1672_v22 = vsel %vm841_vm1, %v1668_v26, 0.0 }
 0x940   : > { %1673 = vadd.xlane.f32.xlu1 %v1672_v22 }
 0x9ab   : > { %v1671_v23 = vpop.xlane.xlu1 %1670 }
 0x9ac   : > { %v1675_v28 = vmul.f32 %v1671_v23, %v2535_v20 }
 0x9ae   : > { %v1677_v29 = vadd.f32 1e-05, %v1675_v28 }
 0x9b0   : > { %2270 = vrsqrt.f32 %v1677_v29  ;;  %vm1685_vm4 = vweird.f32 %v1677_v29 }
 0x9b3   : > { %v1674_v31 = vpop.xlane.xlu1 %1673 }
 0x9b4   : > { %v1676_v32 = vmul.f32 %v1674_v31, %v2535_v20  ;;  %v2267_v20 = vld [vmem:[%s2844_s0] ss:$0 sm:$0xff] }
 0x9b6   : > { %v2271_v33 = vpop.eup %2270  ;;  %v1678_v34 = vadd.f32 1e-05, %v1676_v32 }
 0x9b7   : > { %v1680_v35 = vmul.f32 %v2271_v33, %v1677_v29  ;;  %vm1686_vm3 = vweird.f32 %v2271_v33 }
 0x9b8   : > { %2272 = vrsqrt.f32 %v1678_v34  ;;  %vm1687_vm5 = vmor %vm1685_vm4, %vm1686_vm3  ;;  %vm1695_vm7 = vweird.f32 %v1678_v34 }
 0x9b9   : > { %v1681_v36 = vmul.f32 %v2271_v33, %v1680_v35 }
 0x9bb   : > { %v1682_v37 = vmul.f32 0.5, %v1681_v36 }
 0x9bd   : > { %v1683_v38 = vsub.f32 1.5, %v1682_v37 }
 0x9be   : > { %v2273_v39 = vpop.eup %2272 }
 0x9bf   : > { %v1684_v40 = vmul.f32 %v2271_v33, %v1683_v38  ;;  %v1690_v41 = vmul.f32 %v2273_v39, %v1678_v34  ;;  %vm1696_vm6 = vweird.f32 %v2273_v39 }
 0x9c0   : > { %vm1697_vm8 = vmor %vm1695_vm7, %vm1696_vm6 }
 0x9c1   : > { %v1691_v42 = vmul.f32 %v2273_v39, %v1690_v41  ;;  %v1688_v44 = vsel %vm1687_vm5, %v2271_v33, %v1684_v40 }
 0x9c2   : > { %v1699_v47 = vmul.f32 %v1688_v44, %v1665_v16 }
 0x9c3   : > { %v1692_v43 = vmul.f32 0.5, %v1691_v42 }
 0x9c4   : > { %v1704_v53 = vmul.f32 %v2267_v20, %v1699_v47 }
 0x9c5   : > { %v1693_v46 = vsub.f32 1.5, %v1692_v43 }
 0x9c6   : > { %v1709_v58 = vadd.f32 %v2268_v55, %v1704_v53 }
 0x9c7   : > { %v1694_v48 = vmul.f32 %v2273_v39, %v1693_v46 }
 0x9c9   : > { %v1698_v49 = vsel %vm1697_vm8, %v2273_v39, %v1694_v48 }
 0x9ca   : > { %v1700_v51 = vmul.f32 %v1698_v49, %v1666_v30 }
 0x9cc   : > { %v1705_v56 = vmul.f32 %v2267_v20, %v1700_v51 }
 0x9ce   : > { %v1710_v59 = vadd.f32 %v2268_v55, %v1705_v56 }
 0x9d0   : > { %v1711_v10 = vpack.c.bf16 %v1710_v59, %v1709_v58 }
 0x9d2   : > { %2110 = vmatmul.msk.bf16.vlgmr.msra.gmra.mxu0 %vm841_vm1, %v1711_v10 }
 0xa4f   : > { %v1760_v60 = vpop.f32.mrf.mxu0 }
 0xa50   : > { %v1761_v61 = vadd.f32 %v2269_v54, %v1760_v60 }
 0xa52   : > { %1765 = vst [vmem:[%s2509_s17] sm:$0xff] %v1761_v61 }
 0xa57   : > { %v1762_v12 = vpop.f32.mrf.mxu0 }
 0xa58   : > { %v1763_v62 = vadd.f32 %v2269_v54, %v1762_v12 }
 0xa5a   : > { %1766 = vst [vmem:[%s2509_s17 + $0x8] sm:$0xff] %v1763_v62 }
 0xa5b PF: > { %s2847_s6 = sld [smem:[#allocation6_spill]] }
 0xa5c   : > { %s2848_s27 = sld [smem:[#allocation4_spill]] }
 0xa5d   : > { %s2849_s28 = sld [smem:[#allocation5_spill]] }
 0xa5e   : > { %s2850_s29 = sld [smem:[#allocation7_spill]] }
 0xa5f   : > { %s2851_s30 = sld [smem:[#allocation8_spill]] }
 0xa61   : > { %s28_s0 = sadd.s32 1, %s2847_s6  }
 0xa62   : > { %p25_p9 = scmp.ge.s32.totalorder %s28_s0, 6  }
 0xa64   :  { %27 = sbr.rel (!%p25_p9) target bundleno = 12 (0xc), region = 163 }

</bundles_post_ra>
